<compile_context>
chip_gen: v7x
topology: tpu7x:2x2x1
jax: 0.10.0
libtpu: 0.0.40
codegen_flags: <defaults>
</compile_context>

<pallas_src>
import jax
import jax.numpy as jnp
import numpy as np
from jax.experimental import pallas as pl
from jax.experimental.pallas import tpu as pltpu


# ---------------------------------------------------------------------------
# Module "parameters": predefined spherical-Gaussian lobe directions
# (mirrors init_predefined_omega from utils/spec_utils.py).
# ---------------------------------------------------------------------------
def init_predefined_omega(num_theta, num_phi):
    def sph2cart(theta, phi):
        return np.array(
            [np.sin(theta) * np.cos(phi),
             np.sin(theta) * np.sin(phi),
             np.cos(theta)], dtype=np.float64)

    theta_list = np.linspace(0.0, np.pi, num_theta)
    phi_list = np.linspace(0.0, 2.0 * np.pi, num_phi)

    omega, omega_la, omega_mu = [], [], []
    for theta in theta_list:
        for phi in phi_list:
            o = sph2cart(theta, phi)
            o_la = sph2cart(theta + np.pi / 2.0, phi)
            o_mu = np.cross(o_la, o)
            omega.append(o)
            omega_la.append(o_la)
            omega_mu.append(o_mu)

    def pack(lst):
        return jnp.asarray(
            np.stack(lst).reshape(1, num_theta, num_phi, 3), dtype=jnp.float32)

    return pack(omega), pack(omega_la), pack(omega_mu)


# ---------------------------------------------------------------------------
# Pure-JAX reference (mirror of the PyTorch forward). Also used as the
# small-input fallback, where XLA fuses the elementwise chain for free.
# ---------------------------------------------------------------------------
def ree_reference(omega_o, a, la, mu, omega, omega_la, omega_mu):
    dot = jnp.sum(omega_o[:, None, None, :] * omega, axis=-1, keepdims=True)
    smooth = jax.nn.relu(dot)
    la_ = jax.nn.softplus(la - 1.0)
    mu_ = jax.nn.softplus(mu - 1.0)
    d_la = jnp.sum(omega_la * omega_o[:, None, None, :], axis=-1, keepdims=True)
    d_mu = jnp.sum(omega_mu * omega_o[:, None, None, :], axis=-1, keepdims=True)
    return a * smooth * jnp.exp(-la_ * d_la ** 2 - mu_ * d_mu ** 2)


# ---------------------------------------------------------------------------
# Pallas kernel
# ---------------------------------------------------------------------------
def _softplus(x):
    # Numerically stable softplus (matches torch.nn.functional.softplus).
    return jnp.maximum(x, 0.0) + jnp.log(1.0 + jnp.exp(-jnp.abs(x)))


def _ree_kernel(o_ref, a_ref, la_ref, mu_ref, w_ref, wla_ref, wmu_ref, out_ref):
    f32 = jnp.float32
    o = o_ref[...].astype(f32)                 # (tile_n, 3)
    a = a_ref[...].astype(f32)                 # (tile_n, F)
    la = _softplus(la_ref[...].astype(f32) - 1.0)
    mu = _softplus(mu_ref[...].astype(f32) - 1.0)

    ox = o[:, 0:1]                             # (tile_n, 1)
    oy = o[:, 1:2]
    oz = o[:, 2:3]

    def dot3(w):                               # w: (3, F) -> (tile_n, F)
        return ox * w[0:1, :] + oy * w[1:2, :] + oz * w[2:3, :]

    d = dot3(w_ref[...].astype(f32))
    d_la = dot3(wla_ref[...].astype(f32))
    d_mu = dot3(wmu_ref[...].astype(f32))

    smooth = jnp.maximum(d, 0.0)               # relu
    expo = -(la * d_la * d_la + mu * d_mu * d_mu)
    out_ref[...] = (a * smooth * jnp.exp(expo)).astype(out_ref.dtype)


# ---------------------------------------------------------------------------
# Wrapper
# ---------------------------------------------------------------------------
def rendering_equation_encoding(omega_o, a, la, mu, omega, omega_la, omega_mu,
                                *, block_n=2048, force_pallas=False):
    N = omega_o.shape[0]
    _, T, P, _ = omega.shape
    F = T * P
    out_dtype = a.dtype

    # Small-input fallback: launch overhead dominates; plain XLA fuses this.
    if not force_pallas and N * F < (1 << 15):
        return ree_reference(omega_o, a, la, mu, omega, omega_la, omega_mu)

    # Free, contiguous reshapes (no copies): (N, T, P, 1) -> (N, F).
    a2 = a.reshape(N, F)
    la2 = la.reshape(N, F)
    mu2 = mu.reshape(N, F)
    # Tiny constant direction tables as (3, F): component-major rows.
    w = omega.reshape(F, 3).T
    wla = omega_la.reshape(F, 3).T
    wmu = omega_mu.reshape(F, 3).T

    # Row-tile sizing: dtype-aware sublane packing + VMEM budget.
    itemsize = jnp.dtype(out_dtype).itemsize
    pack = max(8, 32 // max(itemsize, 1))       # f32:8, bf16:16, int8/fp8:32
    lanes_pad = pl.cdiv(F, 128) * 128           # VMEM lane padding of F axis
    bytes_per_row = (4 * lanes_pad + 128) * 4   # a, la, mu, out + omega_o (f32)
    vmem_budget = 12 * 1024 * 1024              # stays under v5e 16 MiB scoped
    max_rows = max(pack, (vmem_budget // (2 * bytes_per_row)) // pack * pack)

    tile_n = max(pack, (min(block_n, max_rows) // pack) * pack)
    tile_n = min(tile_n, pl.cdiv(N, pack) * pack)

    grid = (pl.cdiv(N, tile_n),)   # ragged tail handled by Pallas edge masking

    out2d = pl.pallas_call(
        _ree_kernel,
        out_shape=jax.ShapeDtypeStruct((N, F), out_dtype),
        grid_spec=pl.GridSpec(
            grid=grid,
            in_specs=[
                pl.BlockSpec((tile_n, 3), lambda i: (i, 0)),   # omega_o
                pl.BlockSpec((tile_n, F), lambda i: (i, 0)),   # a
                pl.BlockSpec((tile_n, F), lambda i: (i, 0)),   # la
                pl.BlockSpec((tile_n, F), lambda i: (i, 0)),   # mu
                pl.BlockSpec((3, F), lambda i: (0, 0)),        # omega table
                pl.BlockSpec((3, F), lambda i: (0, 0)),        # omega_la table
                pl.BlockSpec((3, F), lambda i: (0, 0)),        # omega_mu table
            ],
            out_specs=pl.BlockSpec((tile_n, F), lambda i: (i, 0)),
        ),
        compiler_params=pltpu.CompilerParams(
            dimension_semantics=("parallel",),
        ),
    )(omega_o, a2, la2, mu2, w, wla, wmu)

    return out2d.reshape(N, T, P, 1)


# ---------------------------------------------------------------------------
# Demo / correctness check
# ---------------------------------------------------------------------------
if __name__ == "__main__":
    num_theta, num_phi = 4, 8
    N = 128

    omega, omega_la, omega_mu = init_predefined_omega(num_theta, num_phi)

    key = jax.random.PRNGKey(0)
    k1, k2, k3, k4 = jax.random.split(key, 4)
    omega_o = jax.random.normal(k1, (N, 3), dtype=jnp.float32)
    omega_o = omega_o / jnp.linalg.norm(omega_o, axis=-1, keepdims=True)
    a = jax.random.normal(k2, (N, num_theta, num_phi, 1), dtype=jnp.float32)
    la = jax.random.normal(k3, (N, num_theta, num_phi, 1), dtype=jnp.float32)
    mu = jax.random.normal(k4, (N, num_theta, num_phi, 1), dtype=jnp.float32)

    out = rendering_equation_encoding(
        omega_o, a, la, mu, omega, omega_la, omega_mu, force_pallas=True)
    jax.block_until_ready(out)

    ref = ree_reference(omega_o, a, la, mu, omega, omega_la, omega_mu)
    assert out.shape == ref.shape == (N, num_theta, num_phi, 1)
    assert out.dtype == ref.dtype
    assert jnp.allclose(out, ref, rtol=1e-5, atol=1e-5), float(
        jnp.max(jnp.abs(out - ref)))

    print("KERNEL_OK")
</pallas_src>

<mosaic_0001>
module attributes {stable_mosaic.version = 11 : i64} {
  func.func @_ree_kernel(%arg0: i32, %arg1: memref<128x3xf32, #tpu.memory_space<vmem>>, %arg2: memref<128x32xf32, #tpu.memory_space<vmem>>, %arg3: memref<128x32xf32, #tpu.memory_space<vmem>>, %arg4: memref<128x32xf32, #tpu.memory_space<vmem>>, %arg5: memref<3x32xf32, #tpu.memory_space<vmem>>, %arg6: memref<3x32xf32, #tpu.memory_space<vmem>>, %arg7: memref<3x32xf32, #tpu.memory_space<vmem>>, %arg8: memref<128x32xf32, #tpu.memory_space<vmem>>) attributes {dimension_semantics = [#tpu.dimension_semantics<parallel>], iteration_bounds = array<i64: 1>, scalar_prefetch = 0 : i64, scratch_operands = 0 : i64, tpu.core_type = #tpu.core_type<tc>, window_params = [{transform_indices = @transform_0, window_bounds = array<i64: 128, 3>}, {transform_indices = @transform_1, window_bounds = array<i64: 128, 32>}, {transform_indices = @transform_2, window_bounds = array<i64: 128, 32>}, {transform_indices = @transform_3, window_bounds = array<i64: 128, 32>}, {pipeline_mode = #tpu.pipeline_mode<synchronous>, transform_indices = @transform_4, window_bounds = array<i64: 3, 32>}, {pipeline_mode = #tpu.pipeline_mode<synchronous>, transform_indices = @transform_5, window_bounds = array<i64: 3, 32>}, {pipeline_mode = #tpu.pipeline_mode<synchronous>, transform_indices = @transform_6, window_bounds = array<i64: 3, 32>}, {transform_indices = @transform_7, window_bounds = array<i64: 128, 32>}]} {
    %c0 = arith.constant 0 : index
    %c0_0 = arith.constant 0 : index
    %0 = vector.load %arg1[%c0, %c0_0] : memref<128x3xf32, #tpu.memory_space<vmem>>, vector<128x3xf32>
    %c0_1 = arith.constant 0 : index
    %c0_2 = arith.constant 0 : index
    %1 = vector.load %arg2[%c0_1, %c0_2] : memref<128x32xf32, #tpu.memory_space<vmem>>, vector<128x32xf32>
    %c0_3 = arith.constant 0 : index
    %c0_4 = arith.constant 0 : index
    %2 = vector.load %arg3[%c0_3, %c0_4] : memref<128x32xf32, #tpu.memory_space<vmem>>, vector<128x32xf32>
    %cst = arith.constant 1.000000e+00 : f32
    %3 = vector.broadcast %cst : f32 to vector<128x32xf32>
    %4 = arith.subf %2, %3 : vector<128x32xf32>
    %cst_5 = arith.constant 0.000000e+00 : f32
    %5 = vector.broadcast %cst_5 : f32 to vector<128x32xf32>
    %6 = arith.maximumf %4, %5 : vector<128x32xf32>
    %7 = math.absf %4 : vector<128x32xf32>
    %cst_6 = arith.constant 0.000000e+00 : f32
    %8 = vector.broadcast %cst_6 : f32 to vector<128x32xf32>
    %9 = arith.subf %8, %7 : vector<128x32xf32>
    %10 = math.exp %9 : vector<128x32xf32>
    %cst_7 = arith.constant 1.000000e+00 : f32
    %11 = vector.broadcast %cst_7 : f32 to vector<128x32xf32>
    %12 = arith.addf %11, %10 : vector<128x32xf32>
    %13 = math.log %12 : vector<128x32xf32>
    %14 = arith.addf %6, %13 : vector<128x32xf32>
    %c0_8 = arith.constant 0 : index
    %c0_9 = arith.constant 0 : index
    %15 = vector.load %arg4[%c0_8, %c0_9] : memref<128x32xf32, #tpu.memory_space<vmem>>, vector<128x32xf32>
    %cst_10 = arith.constant 1.000000e+00 : f32
    %16 = vector.broadcast %cst_10 : f32 to vector<128x32xf32>
    %17 = arith.subf %15, %16 : vector<128x32xf32>
    %cst_11 = arith.constant 0.000000e+00 : f32
    %18 = vector.broadcast %cst_11 : f32 to vector<128x32xf32>
    %19 = arith.maximumf %17, %18 : vector<128x32xf32>
    %20 = math.absf %17 : vector<128x32xf32>
    %cst_12 = arith.constant 0.000000e+00 : f32
    %21 = vector.broadcast %cst_12 : f32 to vector<128x32xf32>
    %22 = arith.subf %21, %20 : vector<128x32xf32>
    %23 = math.exp %22 : vector<128x32xf32>
    %cst_13 = arith.constant 1.000000e+00 : f32
    %24 = vector.broadcast %cst_13 : f32 to vector<128x32xf32>
    %25 = arith.addf %24, %23 : vector<128x32xf32>
    %26 = math.log %25 : vector<128x32xf32>
    %27 = arith.addf %19, %26 : vector<128x32xf32>
    %28 = vector.extract_strided_slice %0 {offsets = [0, 0], sizes = [128, 1], strides = [1, 1]} : vector<128x3xf32> to vector<128x1xf32>
    %29 = vector.extract_strided_slice %0 {offsets = [0, 1], sizes = [128, 1], strides = [1, 1]} : vector<128x3xf32> to vector<128x1xf32>
    %30 = vector.extract_strided_slice %0 {offsets = [0, 2], sizes = [128, 1], strides = [1, 1]} : vector<128x3xf32> to vector<128x1xf32>
    %c0_14 = arith.constant 0 : index
    %c0_15 = arith.constant 0 : index
    %31 = vector.load %arg5[%c0_14, %c0_15] : memref<3x32xf32, #tpu.memory_space<vmem>>, vector<3x32xf32>
    %32 = vector.extract_strided_slice %31 {offsets = [0, 0], sizes = [1, 32], strides = [1, 1]} : vector<3x32xf32> to vector<1x32xf32>
    %33 = vector.broadcast %28 : vector<128x1xf32> to vector<128x32xf32>
    %34 = vector.broadcast %32 : vector<1x32xf32> to vector<128x32xf32>
    %35 = arith.mulf %33, %34 : vector<128x32xf32>
    %36 = vector.extract_strided_slice %31 {offsets = [1, 0], sizes = [1, 32], strides = [1, 1]} : vector<3x32xf32> to vector<1x32xf32>
    %37 = vector.broadcast %29 : vector<128x1xf32> to vector<128x32xf32>
    %38 = vector.broadcast %36 : vector<1x32xf32> to vector<128x32xf32>
    %39 = arith.mulf %37, %38 : vector<128x32xf32>
    %40 = arith.addf %35, %39 : vector<128x32xf32>
    %41 = vector.extract_strided_slice %31 {offsets = [2, 0], sizes = [1, 32], strides = [1, 1]} : vector<3x32xf32> to vector<1x32xf32>
    %42 = vector.broadcast %30 : vector<128x1xf32> to vector<128x32xf32>
    %43 = vector.broadcast %41 : vector<1x32xf32> to vector<128x32xf32>
    %44 = arith.mulf %42, %43 : vector<128x32xf32>
    %45 = arith.addf %40, %44 : vector<128x32xf32>
    %c0_16 = arith.constant 0 : index
    %c0_17 = arith.constant 0 : index
    %46 = vector.load %arg6[%c0_16, %c0_17] : memref<3x32xf32, #tpu.memory_space<vmem>>, vector<3x32xf32>
    %47 = vector.extract_strided_slice %46 {offsets = [0, 0], sizes = [1, 32], strides = [1, 1]} : vector<3x32xf32> to vector<1x32xf32>
    %48 = vector.broadcast %28 : vector<128x1xf32> to vector<128x32xf32>
    %49 = vector.broadcast %47 : vector<1x32xf32> to vector<128x32xf32>
    %50 = arith.mulf %48, %49 : vector<128x32xf32>
    %51 = vector.extract_strided_slice %46 {offsets = [1, 0], sizes = [1, 32], strides = [1, 1]} : vector<3x32xf32> to vector<1x32xf32>
    %52 = vector.broadcast %29 : vector<128x1xf32> to vector<128x32xf32>
    %53 = vector.broadcast %51 : vector<1x32xf32> to vector<128x32xf32>
    %54 = arith.mulf %52, %53 : vector<128x32xf32>
    %55 = arith.addf %50, %54 : vector<128x32xf32>
    %56 = vector.extract_strided_slice %46 {offsets = [2, 0], sizes = [1, 32], strides = [1, 1]} : vector<3x32xf32> to vector<1x32xf32>
    %57 = vector.broadcast %30 : vector<128x1xf32> to vector<128x32xf32>
    %58 = vector.broadcast %56 : vector<1x32xf32> to vector<128x32xf32>
    %59 = arith.mulf %57, %58 : vector<128x32xf32>
    %60 = arith.addf %55, %59 : vector<128x32xf32>
    %c0_18 = arith.constant 0 : index
    %c0_19 = arith.constant 0 : index
    %61 = vector.load %arg7[%c0_18, %c0_19] : memref<3x32xf32, #tpu.memory_space<vmem>>, vector<3x32xf32>
    %62 = vector.extract_strided_slice %61 {offsets = [0, 0], sizes = [1, 32], strides = [1, 1]} : vector<3x32xf32> to vector<1x32xf32>
    %63 = vector.broadcast %28 : vector<128x1xf32> to vector<128x32xf32>
    %64 = vector.broadcast %62 : vector<1x32xf32> to vector<128x32xf32>
    %65 = arith.mulf %63, %64 : vector<128x32xf32>
    %66 = vector.extract_strided_slice %61 {offsets = [1, 0], sizes = [1, 32], strides = [1, 1]} : vector<3x32xf32> to vector<1x32xf32>
    %67 = vector.broadcast %29 : vector<128x1xf32> to vector<128x32xf32>
    %68 = vector.broadcast %66 : vector<1x32xf32> to vector<128x32xf32>
    %69 = arith.mulf %67, %68 : vector<128x32xf32>
    %70 = arith.addf %65, %69 : vector<128x32xf32>
    %71 = vector.extract_strided_slice %61 {offsets = [2, 0], sizes = [1, 32], strides = [1, 1]} : vector<3x32xf32> to vector<1x32xf32>
    %72 = vector.broadcast %30 : vector<128x1xf32> to vector<128x32xf32>
    %73 = vector.broadcast %71 : vector<1x32xf32> to vector<128x32xf32>
    %74 = arith.mulf %72, %73 : vector<128x32xf32>
    %75 = arith.addf %70, %74 : vector<128x32xf32>
    %cst_20 = arith.constant 0.000000e+00 : f32
    %76 = vector.broadcast %cst_20 : f32 to vector<128x32xf32>
    %77 = arith.maximumf %45, %76 : vector<128x32xf32>
    %78 = arith.mulf %14, %60 : vector<128x32xf32>
    %79 = arith.mulf %78, %60 : vector<128x32xf32>
    %80 = arith.mulf %27, %75 : vector<128x32xf32>
    %81 = arith.mulf %80, %75 : vector<128x32xf32>
    %82 = arith.addf %79, %81 : vector<128x32xf32>
    %cst_21 = arith.constant 0.000000e+00 : f32
    %83 = vector.broadcast %cst_21 : f32 to vector<128x32xf32>
    %84 = arith.subf %83, %82 : vector<128x32xf32>
    %85 = arith.mulf %1, %77 : vector<128x32xf32>
    %86 = math.exp %84 : vector<128x32xf32>
    %87 = arith.mulf %85, %86 : vector<128x32xf32>
    %c0_22 = arith.constant 0 : index
    %c0_23 = arith.constant 0 : index
    %88 = vector.load %arg8[%c0_22, %c0_23] : memref<128x32xf32, #tpu.memory_space<vmem>>, vector<128x32xf32>
    tpu.vector_store %arg8[%c0_22, %c0_23], %87 {strides = array<i32>} : memref<128x32xf32, #tpu.memory_space<vmem>>, vector<128x32xf32>,
    return
  }
  func.func @transform_0(%arg0: i32) -> (i32, i32) {
    %c0_i32 = arith.constant 0 : i32
    %c0_i32_0 = arith.constant 0 : i32
    return %arg0, %c0_i32 : i32, i32
  }
  func.func @transform_1(%arg0: i32) -> (i32, i32) {
    %c0_i32 = arith.constant 0 : i32
    %c0_i32_0 = arith.constant 0 : i32
    return %arg0, %c0_i32 : i32, i32
  }
  func.func @transform_2(%arg0: i32) -> (i32, i32) {
    %c0_i32 = arith.constant 0 : i32
    %c0_i32_0 = arith.constant 0 : i32
    return %arg0, %c0_i32 : i32, i32
  }
  func.func @transform_3(%arg0: i32) -> (i32, i32) {
    %c0_i32 = arith.constant 0 : i32
    %c0_i32_0 = arith.constant 0 : i32
    return %arg0, %c0_i32 : i32, i32
  }
  func.func @transform_4(%arg0: i32) -> (i32, i32) {
    %c0_i32 = arith.constant 0 : i32
    %c0_i32_0 = arith.constant 0 : i32
    %c0_i32_1 = arith.constant 0 : i32
    return %c0_i32, %c0_i32_0 : i32, i32
  }
  func.func @transform_5(%arg0: i32) -> (i32, i32) {
    %c0_i32 = arith.constant 0 : i32
    %c0_i32_0 = arith.constant 0 : i32
    %c0_i32_1 = arith.constant 0 : i32
    return %c0_i32, %c0_i32_0 : i32, i32
  }
  func.func @transform_6(%arg0: i32) -> (i32, i32) {
    %c0_i32 = arith.constant 0 : i32
    %c0_i32_0 = arith.constant 0 : i32
    %c0_i32_1 = arith.constant 0 : i32
    return %c0_i32, %c0_i32_0 : i32, i32
  }
  func.func @transform_7(%arg0: i32) -> (i32, i32) {
    %c0_i32 = arith.constant 0 : i32
    %c0_i32_0 = arith.constant 0 : i32
    return %arg0, %c0_i32 : i32, i32
  }
}

</mosaic_0001>

<bundles_post_ra>
// kernel: tpu_custom_call.1
= control target key start
LH: loop header
LB: loop body
LE: loop exit
PB: predicated region body
PF: predicated region fallthrough
CT: control target
= control target key end

     0   :  { %v1295_v0 = vmov 0   ;;  %v1296_v17 = vmov 1   ;;  %v1297_v24 = vmov 2   ;;  %vm1073_vm0 = vcmask 261120   ;;  %s2541_s0 = inlined_call_operand.vmem [shape: f32[128,3], index: 0, kind: input, shape index: {}]   ;;  %s2542_s2 = inlined_call_operand.vmem [shape: f32[128,32], index: 2, kind: input, shape index: {}]   ;;  %s2543_s3 = inlined_call_operand.vmem [shape: f32[128,32], index: 3, kind: input, shape index: {}]   ;;  %s2544_s4 = inlined_call_operand.vmem [shape: f32[3,32], index: 4, kind: input, shape index: {}]   ;;  %s2545_s5 = inlined_call_operand.vmem [shape: f32[3,32], index: 5, kind: input, shape index: {}]   ;;  %s2546_s6 = inlined_call_operand.vmem [shape: f32[3,32], index: 6, kind: input, shape index: {}]   ;;  %s2547_s1 = inlined_call_operand.vmem [shape: f32[128,32], index: 1, kind: input, shape index: {}]   ;;  %s2548_s7 = inlined_call_operand.vmem [shape: f32[128,32], index: 7, kind: output, shape index: {}]  }
   0x1   :  { %1130 = vset.pattern.permute.xlu1 %v1295_v0  ;;  %1129 = vset.pattern.permute.xlu0 %v1295_v0  ;;  %v1341_v1 = vld [vmem:[%s2541_s0 + $0x10] sm:$0xff]  ;;  %v26_v2 = vld [vmem:[%s2541_s0] sm:$0xff]  ;;  %v1350_v3 = vld [vmem:[%s2541_s0 + $0x18] sm:$0xff] }
   0x2   :  { %423 = vperm.xlu1 %1130, %v1341_v1   ;;  %413 = vperm.xlu0 %1129, %v26_v2   ;;  %v27_v4 = vld [vmem:[%s2541_s0 + $0x8] sm:$0xff]  ;;  %v1364_v6 = vld [vmem:[%s2541_s0 + $0x20] sm:$0xff]  ;;  %v1371_v7 = vld [vmem:[%s2541_s0 + $0x38] sm:$0xff] }
   0x3   :  { %v1359_v5 = vld [vmem:[%s2541_s0 + $0x28] sm:$0xff]  ;;  %v1376_v8 = vld [vmem:[%s2541_s0 + $0x30] sm:$0xff]  ;;  %v1388_v10 = vld [vmem:[%s2541_s0 + $0x40] sm:$0xff] }
   0x4   :  { %v1383_v9 = vld [vmem:[%s2541_s0 + $0x48] sm:$0xff]  ;;  %v1395_v11 = vld [vmem:[%s2541_s0 + $0x58] sm:$0xff]  ;;  %v1400_v12 = vld [vmem:[%s2541_s0 + $0x50] sm:$0xff] }
   0x5   :  { %v1407_v13 = vld [vmem:[%s2541_s0 + $0x68] sm:$0xff]  ;;  %v1412_v14 = vld [vmem:[%s2541_s0 + $0x60] sm:$0xff]  ;;  %v1419_v15 = vld [vmem:[%s2541_s0 + $0x78] sm:$0xff] }
   0x6   :  { %428 = vperm.xlu1 %1130, %v1350_v3   ;;  %418 = vperm.xlu0 %1129, %v27_v4   ;;  %v1424_v16 = vld [vmem:[%s2541_s0 + $0x70] sm:$0xff]  ;;  %v58_v18 = vld [vmem:[%s2542_s2] sm:$0xff]  ;;  %v59_v21 = vld [vmem:[%s2542_s2 + $0x8] sm:$0xff] }
   0x7   :  { %v234_v19 = vld [vmem:[%s2543_s3] sm:$0xff]  ;;  %v1448_v20 = vadd.f32 -1.0, %v58_v18  ;;  %v235_v23 = vld [vmem:[%s2543_s3 + $0x8] sm:$0xff]  ;;  %v1458_v25 = vadd.f32 -1.0, %v59_v21  ;;  %v60_v28 = vld [vmem:[%s2542_s2 + $0x10] sm:$0xff] }
   0x8   :  { %v1453_v22 = vadd.f32 -1.0, %v234_v19  ;;  %v1461_v27 = vadd.f32 -1.0, %v235_v23  ;;  %v236_v30 = vld [vmem:[%s2543_s3 + $0x10] sm:$0xff]  ;;  %v62_v32 = vld [vmem:[%s2542_s2 + $0x20] sm:$0xff]  ;;  %v1476_v34 = vadd.f32 -1.0, %v60_v28  ;;  %v61_v38 = vld [vmem:[%s2542_s2 + $0x18] sm:$0xff] }
   0x9   :  { %v106_v26 = vand.u32 2147483647, %v1448_v20  ;;  %v107_v31 = vand.u32 2147483647, %v1458_v25  ;;  %v238_v35 = vld [vmem:[%s2543_s3 + $0x20] sm:$0xff]  ;;  %v1482_v37 = vadd.f32 -1.0, %v236_v30 }
   0xa   :  { %438 = vperm.xlu1 %1130, %v1359_v5   ;;  %433 = vperm.xlu0 %1129, %v1364_v6   ;;  %v282_v29 = vand.u32 2147483647, %v1453_v22  ;;  %v283_v36 = vand.u32 2147483647, %v1461_v27  ;;  %v1487_v40 = vadd.f32 -1.0, %v62_v32  ;;  %v1489_v42 = vadd.f32 -1.0, %v238_v35 }
   0xb   :  { %v122_v33 = vsub.f32 0.0, %v106_v26  ;;  %v123_v41 = vsub.f32 0.0, %v107_v31  ;;  %v237_v43 = vld [vmem:[%s2543_s3 + $0x18] sm:$0xff]  ;;  %v108_v45 = vand.u32 2147483647, %v1476_v34  ;;  %v1497_v46 = vadd.f32 -1.0, %v61_v38 }
   0xc   :  { %v298_v39 = vsub.f32 0.0, %v282_v29  ;;  %v299_v47 = vsub.f32 0.0, %v283_v36  ;;  %v284_v48 = vand.u32 2147483647, %v1482_v37  ;;  %v64_v49 = vld [vmem:[%s2542_s2 + $0x30] sm:$0xff]  ;;  %v1504_v52 = vadd.f32 -1.0, %v237_v43 }
   0xd   :  { %v138_v44 = vmul.f32 1.442695, %v122_v33  ;;  %v110_v51 = vand.u32 2147483647, %v1487_v40  ;;  %v140_v53 = vmul.f32 1.442695, %v123_v41 }
   0xe   :  { %448 = vperm.xlu1 %1130, %v1371_v7   ;;  %443 = vperm.xlu0 %1129, %v1376_v8   ;;  %v314_v50 = vmul.f32 1.442695, %v298_v39  ;;  %v286_v54 = vand.u32 2147483647, %v1489_v42  ;;  %v240_v55 = vld [vmem:[%s2543_s3 + $0x30] sm:$0xff]  ;;  %v124_v56 = vsub.f32 0.0, %v108_v45 }
   0xf   :  { %1135 = vpow2.f32 %v138_v44  ;;  %v109_v57 = vand.u32 2147483647, %v1497_v46  ;;  %v1513_v58 = vadd.f32 -1.0, %v64_v49  ;;  %v63_v59 = vld [vmem:[%s2542_s2 + $0x28] sm:$0xff]  ;;  %v316_v60 = vmul.f32 1.442695, %v299_v47 }
  0x10   :  { %v300_v61 = vsub.f32 0.0, %v284_v48  ;;  %v126_v62 = vsub.f32 0.0, %v110_v51  ;;  %v285_v63 = vand.u32 2147483647, %v1504_v52  ;;  %v1519_v0 = vadd.f32 -1.0, %v240_v55  ;;  %v65_v38 = vld [vmem:[%s2542_s2 + $0x38] sm:$0xff] }
  0x11   :  { %1137 = vpow2.f32 %v314_v50  ;;  %v1556_v49 = vadd.f32 -1.0, %v65_v38 }
  0x12   :  { %458 = vperm.xlu1 %1130, %v1383_v9   ;;  %453 = vperm.xlu0 %1129, %v1388_v10   ;;  %1139 = vpow2.f32 %v140_v53  ;;  %v301_v18 = vsub.f32 0.0, %v285_v63  ;;  %v288_v19 = vand.u32 2147483647, %v1519_v0 }
  0x13   :  { %1141 = vpow2.f32 %v316_v60 }
  0x14   :  { %v320_v29 = vmul.f32 1.442695, %v301_v18  ;;  %v304_v30 = vsub.f32 0.0, %v288_v19 }
  0x16   :  { %468 = vperm.xlu1 %1130, %v1395_v11   ;;  %463 = vperm.xlu0 %1129, %v1400_v12   ;;  %v326_v41 = vmul.f32 1.442695, %v304_v30 }
  0x19   :  { %v1136_v28 = vpop.eup %1135 }
  0x1a   :  { %478 = vperm.xlu1 %1130, %v1407_v13   ;;  %473 = vperm.xlu0 %1129, %v1412_v14   ;;  %v170_v36 = vadd.f32 1.0, %v1136_v28 }
  0x1b   :  { %v1138_v35 = vpop.eup %1137 }
  0x1c   :  { %v1140_v39 = vpop.eup %1139  ;;  %v346_v47 = vadd.f32 1.0, %v1138_v35 }
  0x1d   :  { %v171_v50 = vadd.f32 1.0, %v1140_v39  ;;  %v69_v39 = vld [vmem:[%s2542_s2 + $0x58] sm:$0xff] }
  0x1e   :  { %488 = vperm.xlu1 %1130, %v1419_v15   ;;  %483 = vperm.xlu0 %1129, %v1424_v16  }
  0x22   :  { %1132 = vset.pattern.permute.xlu1 %v1296_v17  ;;  %1131 = vset.pattern.permute.xlu0 %v1296_v17  ;;  %v146_v17 = vmul.f32 1.442695, %v126_v62 }
  0x23   :  { %516 = vperm.xlu1 %1132, %v27_v4   ;;  %512 = vperm.xlu0 %1131, %v26_v2  }
  0x27   :  { %520 = vperm.xlu1 %1132, %v1341_v1   ;;  %524 = vperm.xlu0 %1131, %v1350_v3  }
  0x2b   :  { %528 = vperm.xlu1 %1132, %v1364_v6   ;;  %532 = vperm.xlu0 %1131, %v1359_v5  }
  0x2f   :  { %536 = vperm.xlu1 %1132, %v1376_v8   ;;  %540 = vperm.xlu0 %1131, %v1371_v7  }
  0x33   :  { %544 = vperm.xlu1 %1132, %v1388_v10   ;;  %548 = vperm.xlu0 %1131, %v1383_v9  }
  0x37   :  { %552 = vperm.xlu1 %1132, %v1400_v12   ;;  %556 = vperm.xlu0 %1131, %v1395_v11  }
  0x3b   :  { %560 = vperm.xlu1 %1132, %v1412_v14   ;;  %564 = vperm.xlu0 %1131, %v1407_v13  }
  0x3f   :  { %568 = vperm.xlu1 %1132, %v1424_v16   ;;  %572 = vperm.xlu0 %1131, %v1419_v15  }
  0x43   :  { %1133 = vset.pattern.permute.xlu1 %v1297_v24  ;;  %1134 = vset.pattern.permute.xlu0 %v1297_v24 }
  0x44   :  { %612 = vperm.xlu1 %1133, %v26_v2   ;;  %616 = vperm.xlu0 %1134, %v27_v4   ;;  %v1521_v2 = vadd.f32 -1.0, %v63_v59  ;;  %v142_v4 = vmul.f32 1.442695, %v124_v56 }
  0x46   :  { %1143 = vpow2.f32 %v142_v4 }
  0x48   :  { %620 = vperm.xlu1 %1133, %v1341_v1   ;;  %628 = vperm.xlu0 %1134, %v1364_v6   ;;  %v302_v1 = vsub.f32 0.0, %v286_v54  ;;  %v112_v6 = vand.u32 2147483647, %v1513_v58 }
  0x4a   :  { %v128_v24 = vsub.f32 0.0, %v112_v6 }
  0x4c   :  { %624 = vperm.xlu1 %1133, %v1350_v3   ;;  %636 = vperm.xlu0 %1134, %v1376_v8   ;;  %v239_v3 = vld [vmem:[%s2543_s3 + $0x28] sm:$0xff]  ;;  %v318_v8 = vmul.f32 1.442695, %v300_v61  ;;  %v113_v61 = vand.u32 2147483647, %v1556_v49 }
  0x4d   :  { %v1533_v21 = vadd.f32 -1.0, %v239_v3  ;;  %v244_v3 = vld [vmem:[%s2543_s3 + $0x50] sm:$0xff] }
  0x4e   :  { %1145 = vpow2.f32 %v318_v8 }
  0x4f   :  { %1147 = vpow2.f32 %v146_v17  ;;  %v287_v31 = vand.u32 2147483647, %v1533_v21  ;;  %v67_v17 = vld [vmem:[%s2542_s2 + $0x48] sm:$0xff] }
  0x50   :  { %632 = vperm.xlu1 %1133, %v1359_v5   ;;  %644 = vperm.xlu0 %1134, %v1388_v10   ;;  %v125_v5 = vsub.f32 0.0, %v109_v57  ;;  %v66_v10 = vld [vmem:[%s2542_s2 + $0x40] sm:$0xff] }
  0x51   :  { %v1538_v26 = vadd.f32 -1.0, %v66_v10  ;;  %v303_v43 = vsub.f32 0.0, %v287_v31 }
  0x52   :  { %v144_v23 = vmul.f32 1.442695, %v125_v5 }
  0x53   :  { %v114_v33 = vand.u32 2147483647, %v1538_v26  ;;  %v324_v54 = vmul.f32 1.442695, %v303_v43 }
  0x54   :  { %640 = vperm.xlu1 %1133, %v1371_v7   ;;  %652 = vperm.xlu0 %1134, %v1400_v12   ;;  %v322_v7 = vmul.f32 1.442695, %v302_v1  ;;  %v111_v12 = vand.u32 2147483647, %v1521_v2 }
  0x55   :  { %v130_v48 = vsub.f32 0.0, %v114_v33 }
  0x56   :  { %1149 = vpow2.f32 %v322_v7  ;;  %v127_v32 = vsub.f32 0.0, %v111_v12  ;;  %v129_v7 = vsub.f32 0.0, %v113_v61  ;;  %v1575_v12 = vadd.f32 -1.0, %v244_v3 }
  0x57   :  { %1151 = vpow2.f32 %v144_v23  ;;  %v154_v60 = vmul.f32 1.442695, %v130_v48  ;;  %v243_v23 = vld [vmem:[%s2543_s3 + $0x48] sm:$0xff] }
  0x58   :  { %648 = vperm.xlu1 %1133, %v1383_v9   ;;  %660 = vperm.xlu0 %1134, %v1412_v14   ;;  %v242_v9 = vld [vmem:[%s2543_s3 + $0x40] sm:$0xff]  ;;  %v150_v14 = vmul.f32 1.442695, %v128_v24  ;;  %1153 = vpow2.f32 %v320_v29  ;;  %v148_v45 = vmul.f32 1.442695, %v127_v32  ;;  %v1593_v38 = vadd.f32 -1.0, %v243_v23 }
  0x59   :  { %v1550_v44 = vadd.f32 -1.0, %v242_v9  ;;  %v70_v29 = vld [vmem:[%s2542_s2 + $0x60] sm:$0xff]  ;;  %v1584_v9 = vadd.f32 -1.0, %v67_v17  ;;  %v152_v43 = vmul.f32 1.442695, %v129_v7  ;;  %v248_v17 = vld [vmem:[%s2543_s3 + $0x70] sm:$0xff] }
  0x5a   :  { %1155 = vpow2.f32 %v150_v14  ;;  %v246_v14 = vld [vmem:[%s2543_s3 + $0x60] sm:$0xff]  ;;  %v291_v61 = vand.u32 2147483647, %v1593_v38 }
  0x5b   :  { %1157 = vlog2.f32 %v170_v36  ;;  %v290_v55 = vand.u32 2147483647, %v1550_v44 }
  0x5c   :  { %656 = vperm.xlu1 %1133, %v1395_v11   ;;  %668 = vperm.xlu0 %1134, %v1424_v16   ;;  %v241_v11 = vld [vmem:[%s2543_s3 + $0x38] sm:$0xff]  ;;  %v1142_v16 = vpop.eup %1141  ;;  %1159 = vpow2.f32 %v326_v41 }
  0x5d   :  { %v1558_v51 = vadd.f32 -1.0, %v241_v11  ;;  %v1144_v53 = vpop.eup %1143  ;;  %v347_v57 = vadd.f32 1.0, %v1142_v16  ;;  %1161 = vpow2.f32 %v148_v45  ;;  %v306_v6 = vsub.f32 0.0, %v290_v55  ;;  %v245_v45 = vld [vmem:[%s2543_s3 + $0x58] sm:$0xff] }
  0x5e   :  { %v1146_v56 = vpop.eup %1145  ;;  %1163 = vlog2.f32 %v346_v47  ;;  %v172_v63 = vadd.f32 1.0, %v1144_v53  ;;  %v292_v11 = vand.u32 2147483647, %v1575_v12  ;;  %v1599_v16 = vadd.f32 -1.0, %v70_v29 }
  0x5f   :  { %v1148_v59 = vpop.eup %1147  ;;  %1165 = vlog2.f32 %v171_v50  ;;  %v289_v1 = vand.u32 2147483647, %v1558_v51  ;;  %v348_v5 = vadd.f32 1.0, %v1146_v56  ;;  %v330_v31 = vmul.f32 1.442695, %v306_v6 }
  0x60   :  { %664 = vperm.xlu1 %1133, %v1407_v13   ;;  %v68_v13 = vld [vmem:[%s2542_s2 + $0x50] sm:$0xff]  ;;  %v1150_v62 = vpop.eup %1149  ;;  %1167 = vpow2.f32 %v324_v54  ;;  %v174_v10 = vadd.f32 1.0, %v1148_v59  ;;  %v1604_v53 = vadd.f32 -1.0, %v246_v14  ;;  %v115_v56 = vand.u32 2147483647, %v1584_v9 }
  0x61   :  { %v1152_v4 = vpop.eup %1151  ;;  %v1570_v8 = vadd.f32 -1.0, %v68_v13  ;;  %1169 = vlog2.f32 %v347_v57  ;;  %v350_v19 = vadd.f32 1.0, %v1150_v62  ;;  %v305_v28 = vsub.f32 0.0, %v289_v1  ;;  %v72_v13 = vld [vmem:[%s2542_s2 + $0x70] sm:$0xff] }
  0x62   :  { %v1154_v18 = vpop.eup %1153  ;;  %1171 = vpow2.f32 %v154_v60  ;;  %v173_v24 = vadd.f32 1.0, %v1152_v4  ;;  %v1609_v57 = vadd.f32 -1.0, %v69_v39  ;;  %v1617_v62 = vadd.f32 -1.0, %v245_v45 }
  0x63   :  { %1173 = vlog2.f32 %v172_v63  ;;  %v116_v32 = vand.u32 2147483647, %v1570_v8  ;;  %v349_v36 = vadd.f32 1.0, %v1154_v18  ;;  %v328_v50 = vmul.f32 1.442695, %v305_v28 }
  0x64   :  { %672 = vperm.xlu1 %1133, %v1419_v15   ;;  %v491_v15 = vlaneseq  ;;  %v1156_v30 = vpop.eup %1155  ;;  %1175 = vlog2.f32 %v348_v5  ;;  %2566 = vst [vmem:[#allocation2_spill] sm:$0xff] %v1609_v57  ;;  %2567 = vst [vmem:[#allocation3_spill] sm:$0xff] %v1617_v62  ;;  %v308_v3 = vsub.f32 0.0, %v292_v11  ;;  %v118_v4 = vand.u32 2147483647, %v1599_v16 }
  0x65   :  { %v1589_v33 = vpop.eup %1157  ;;  %1177 = vlog2.f32 %v174_v10  ;;  %v176_v48 = vadd.f32 1.0, %v1156_v30  ;;  %v132_v55 = vsub.f32 0.0, %v116_v32  ;;  %v1626_v10 = vadd.f32 -1.0, %v72_v13  ;;  %v247_v32 = vld [vmem:[%s2543_s3 + $0x68] sm:$0xff] }
  0x66   :  { %v1591_v35 = vshrl.u32 %v491_v15, 7  ;;  %v1160_v41 = vpop.eup %1159  ;;  %1179 = vlog2.f32 %v350_v19  ;;  %v294_v15 = vand.u32 2147483647, %v1604_v53  ;;  %v131_v7 = vsub.f32 0.0, %v115_v56 }
  0x67   :  { %v1162_v47 = vpop.eup %1161  ;;  %1181 = vlog2.f32 %v173_v24  ;;  %v352_v60 = vadd.f32 1.0, %v1160_v41  ;;  %2568 = vst [vmem:[#allocation4_spill] sm:$0xff] %v1626_v10  ;;  %v158_v19 = vmul.f32 1.442695, %v132_v55  ;;  %v117_v23 = vand.u32 2147483647, %v1609_v57 }
  0x68   :  { %v1606_v54 = vpop.eup %1163  ;;  %1183 = vpow2.f32 %v330_v31  ;;  %v175_v1 = vadd.f32 1.0, %v1162_v47  ;;  %v1623_v6 = vsub.s32 0, %v1591_v35  ;;  %v71_v24 = vld [vmem:[%s2542_s2 + $0x68] sm:$0xff]  ;;  %v307_v30 = vsub.f32 0.0, %v291_v61 }
  0x69   :  { %v1614_v59 = vpop.eup %1165  ;;  %1185 = vlog2.f32 %v349_v36  ;;  %v293_v31 = vand.u32 2147483647, %v1617_v62  ;;  %v334_v36 = vmul.f32 1.442695, %v308_v3  ;;  %v134_v39 = vsub.f32 0.0, %v118_v4  ;;  %v249_v4 = vld [vmem:[%s2543_s3 + $0x78] sm:$0xff] }
  0x6a   :  { %v1168_v63 = vpop.eup %1167  ;;  %1187 = vpow2.f32 %v152_v43  ;;  %v1643_v41 = vadd.f32 -1.0, %v248_v17  ;;  %v310_v45 = vsub.f32 0.0, %v294_v15  ;;  %v120_v47 = vand.u32 2147483647, %v1626_v10 }
  0x6b   :  { %v1620_v5 = vpop.eup %1169  ;;  %1189 = vlog2.f32 %v176_v48  ;;  %v351_v29 = vadd.f32 1.0, %v1168_v63  ;;  %v1648_v48 = vadd.f32 -1.0, %v71_v24  ;;  %v156_v56 = vmul.f32 1.442695, %v131_v7  ;;  %v1662_v63 = vld [vmem:[%s2544_s4] sm:$0x7] }
  0x6c   :  { %v1172_v18 = vpop.eup %1171  ;;  %1191 = vpow2.f32 %v328_v50  ;;  %2569 = vst [vmem:[#allocation5_spill] sm:$0xff] %v1643_v41  ;;  %v73_v50 = vld [vmem:[%s2542_s2 + $0x78] sm:$0xff]  ;;  %v133_v13 = vsub.f32 0.0, %v117_v23  ;;  %v309_v3 = vsub.f32 0.0, %v293_v31  ;;  %v162_v17 = vmul.f32 1.442695, %v134_v39 }
  0x6d   :  { %v1635_v28 = vpop.eup %1173  ;;  %1193 = vlog2.f32 %v352_v60  ;;  %v178_v11 = vadd.f32 1.0, %v1172_v18  ;;  %2570 = vst [vmem:[#allocation6_spill] sm:$0xff] %v1648_v48  ;;  %v1655_v60 = vadd.f32 -1.0, %v247_v32  ;;  %v296_v18 = vand.u32 2147483647, %v1643_v41 }
  0x6e   :  { %v1641_v14 = vpop.eup %1175  ;;  %1195 = vlog2.f32 %v175_v1  ;;  %v332_v1 = vmul.f32 1.442695, %v307_v30  ;;  %v338_v23 = vmul.f32 1.442695, %v310_v45  ;;  %v136_v24 = vsub.f32 0.0, %v120_v47 }
  0x6f   :  { %v1645_v43 = vpop.eup %1177  ;;  %1197 = vpow2.f32 %v158_v19  ;;  %2571 = vst [vmem:[#allocation7_spill] sm:$0xff] %v1655_v60  ;;  %v1668_v19 = vadd.f32 -1.0, %v73_v50  ;;  %v160_v31 = vmul.f32 1.442695, %v133_v13  ;;  %v295_v32 = vand.u32 2147483647, %v1655_v60 }
  0x70   :  { %v1653_v55 = vpop.eup %1179  ;;  %1199 = vlog2.f32 %v351_v29  ;;  %v119_v29 = vand.u32 2147483647, %v1648_v48  ;;  %v1674_v10 = vadd.f32 -1.0, %v249_v4  ;;  %v1680_v39 = vrot.slane %v1662_v63, %v1623_v6  ;;  %v1688_v50 = vld [vmem:[%s2546_s6] sm:$0x7] }
  0x71   :  { %v1657_v61 = vpop.eup %1181  ;;  %1201 = vpow2.f32 %v334_v36  ;;  %2572 = vst [vmem:[#allocation8_spill] sm:$0xff] %v1668_v19  ;;  %v336_v45 = vmul.f32 1.442695, %v309_v3  ;;  %v312_v13 = vsub.f32 0.0, %v296_v18  ;;  %v121_v4 = vand.u32 2147483647, %v1668_v19 }
  0x72   :  { %v1184_v15 = vpop.eup %1183  ;;  %1203 = vlog2.f32 %v178_v11  ;;  %2573 = vst [vmem:[#allocation9_spill] sm:$0xff] %v1674_v10  ;;  %2574 = vst [vmem:[#allocation10_spill] sm:$0xff] %v1680_v39  ;;  %v711_v11 = vld [vmem:[%s2545_s5] sm:$0x7]  ;;  %v577_v39 = vsub.s32 1, %v1591_v35  ;;  %v135_v41 = vsub.f32 0.0, %v119_v29 }
  0x73   :  { %v1670_v7 = vpop.eup %1185  ;;  %1205 = vpow2.f32 %v156_v56  ;;  %v354_v56 = vadd.f32 1.0, %v1184_v15  ;;  %v166_v48 = vmul.f32 1.442695, %v136_v24  ;;  %v311_v62 = vsub.f32 0.0, %v295_v32 }
  0x74   :  { %v1188_v30 = vpop.eup %1187  ;;  %1207 = vpow2.f32 %v332_v1  ;;  %v297_v57 = vand.u32 2147483647, %v1674_v10  ;;  %v1698_v15 = vrot.slane %v711_v11, %v1623_v6  ;;  %v342_v24 = vmul.f32 1.442695, %v312_v13 }
  0x75   :  { %v1676_v36 = vpop.eup %1189  ;;  %1209 = vpow2.f32 %v162_v17  ;;  %v177_v3 = vadd.f32 1.0, %v1188_v30  ;;  %v1702_v17 = vrot.slane %v1688_v50, %v1623_v6  ;;  %v137_v29 = vsub.f32 0.0, %v121_v4 }
  0x76   :  { %v1192_v47 = vpop.eup %1191  ;;  %1211 = vpow2.f32 %v338_v23  ;;  %2575 = vst [vmem:[#allocation11_spill] sm:$0xff] %v1698_v15  ;;  %v677_v23 = vsub.s32 2, %v1591_v35  ;;  %v1712_v15 = vrot.slane %v1662_v63, %v577_v39  ;;  %v1714_v10 = vrot.slane %v711_v11, %v577_v39 }
  0x77   :  { %v1691_v60 = vpop.eup %1193  ;;  %1213 = vpow2.f32 %v160_v31  ;;  %2576 = vst [vmem:[#allocation12_spill] sm:$0xff] %v1702_v17  ;;  %v353_v18 = vadd.f32 1.0, %v1192_v47  ;;  %v164_v6 = vmul.f32 1.442695, %v135_v41  ;;  %v1717_v47 = vrot.slane %v1688_v50, %v577_v39 }
  0x78   :  { %v1694_v1 = vpop.eup %1195  ;;  %1215 = vpow2.f32 %v336_v45  ;;  %2578 = vst [vmem:[#allocation14_spill] sm:$0xff] %v1712_v15  ;;  %2579 = vst [vmem:[#allocation15_spill] sm:$0xff] %v1714_v10  ;;  %v340_v35 = vmul.f32 1.442695, %v311_v62  ;;  %v90_v4 = vmax.f32 %v1448_v20, 0.0  ;;  %v1724_v10 = vrot.slane %v1662_v63, %v677_v23 }
  0x79   :  { %v1198_v19 = vpop.eup %1197  ;;  %1217 = vlog2.f32 %v354_v56  ;;  %2580 = vst [vmem:[#allocation16_spill] sm:$0xff] %v1717_v47  ;;  %v313_v56 = vsub.f32 0.0, %v297_v57  ;;  %v1726_v41 = vrot.slane %v711_v11, %v677_v23  ;;  %v187_v62 = vmul.f32 0.6931472, %v1589_v33 }
  0x7a   :  { %v1705_v30 = vpop.eup %1199  ;;  %1219 = vpow2.f32 %v166_v48  ;;  %v180_v17 = vadd.f32 1.0, %v1198_v19  ;;  %2581 = vst [vmem:[#allocation17_spill] sm:$0xff] %v1724_v10  ;;  %v168_v48 = vmul.f32 1.442695, %v137_v29  ;;  %v91_v20 = vmax.f32 %v1458_v25, 0.0 }
  0x7b   :  { %v1202_v45 = vpop.eup %1201  ;;  %1221 = vlog2.f32 %v177_v3  ;;  %2582 = vst [vmem:[#allocation18_spill] sm:$0xff] %v1726_v41  ;;  %v267_v63 = vmax.f32 %v1461_v27, 0.0  ;;  %v344_v11 = vmul.f32 1.442695, %v313_v56  ;;  %v189_v29 = vmul.f32 0.6931472, %v1614_v59 }
  0x7c   :  { %v1719_v13 = vpop.eup %1203  ;;  %1223 = vlog2.f32 %v353_v18  ;;  %v363_v18 = vmul.f32 0.6931472, %v1606_v54  ;;  %v365_v10 = vmul.f32 0.6931472, %v1620_v5  ;;  %v92_v33 = vmax.f32 %v1476_v34, 0.0 }
  0x7d   :  { %v1206_v15 = vpop.eup %1205  ;;  %1225 = vpow2.f32 %v342_v24  ;;  %v191_v25 = vmul.f32 0.6931472, %v1635_v28  ;;  %v1747_v59 = vrot.slane %v1688_v50, %v677_v23  ;;  %v268_v34 = vmax.f32 %v1482_v37, 0.0 }
  0x7e   :  { %v1208_v39 = vpop.eup %1207  ;;  %1227 = vpow2.f32 %v164_v6  ;;  %v179_v41 = vadd.f32 1.0, %v1206_v15  ;;  %v367_v28 = vmul.f32 0.6931472, %v1641_v14  ;;  %v1759_v50 = vadd.f32 %v365_v10, %v267_v63 }
  0x7f   :  { %v1210_v19 = vpop.eup %1209  ;;  %1229 = vpow2.f32 %v340_v35  ;;  %v355_v6 = vadd.f32 1.0, %v1208_v39  ;;  %v1744_v35 = vadd.f32 %v187_v62, %v90_v4  ;;  %v1755_v39 = vadd.f32 %v189_v29, %v91_v20 }
  0x80   :  { %v1212_v24 = vpop.eup %1211  ;;  %1231 = vlog2.f32 %v180_v17  ;;  %v182_v5 = vadd.f32 1.0, %v1210_v19  ;;  %2586 = vst [vmem:[#allocation22_spill] sm:$0xff] %v1759_v50  ;;  %v1761_v23 = vadd.f32 %v191_v25, %v92_v33  ;;  %v195_v20 = vmul.f32 0.6931472, %v1645_v43 }
  0x81   :  { %v1707_v31 = vpop.permute.xlu1 %423  ;;  %v1709_v32 = vpop.permute.xlu0 %413  ;;  %1233 = vpow2.f32 %v168_v48  ;;  %2583 = vst [vmem:[#allocation19_spill] sm:$0xff] %v1744_v35  ;;  %v358_v17 = vadd.f32 1.0, %v1212_v24  ;;  %2585 = vst [vmem:[#allocation21_spill] sm:$0xff] %v1755_v39  ;;  %v1772_v10 = vadd.f32 %v367_v28, %v268_v34  ;;  %v93_v24 = vmax.f32 %v1497_v46, 0.0  ;;  %v2635_v39 = vld [vmem:[#allocation16_spill] sm:$0xff] }
  0x82   :  { %2577 = vst [vmem:[#allocation13_spill] sm:$0xff] %v1709_v32  ;;  %v266_v32 = vmax.f32 %v1453_v22, 0.0  ;;  %v356_v22 = vadd.f32 1.0, %v1202_v45  ;;  %v1214_v47 = vpop.eup %1213  ;;  %2587 = vst [vmem:[#allocation23_spill] sm:$0xff] %v1761_v23  ;;  %v193_v29 = vmul.f32 0.6931472, %v1657_v61 }
  0x83   :  { %v1216_v45 = vpop.eup %1215  ;;  %v181_v4 = vadd.f32 1.0, %v1214_v47  ;;  %v270_v47 = vmax.f32 %v1489_v42, 0.0  ;;  %2588 = vst [vmem:[#allocation24_spill] sm:$0xff] %v1772_v10  ;;  %v269_v33 = vmax.f32 %v1504_v52, 0.0  ;;  %v369_v43 = vmul.f32 0.6931472, %v1670_v7 }
  0x84   :  { %1235 = vlog2.f32 %v356_v22  ;;  %v1749_v15 = vpop.eup %1217  ;;  %v1753_v48 = vadd.f32 %v363_v18, %v266_v32  ;;  %v357_v22 = vadd.f32 1.0, %v1216_v45  ;;  %v94_v32 = vmax.f32 %v1487_v40, 0.0  ;;  %v2634_v23 = vld [vmem:[#allocation15_spill] sm:$0xff] }
  0x85   :  { %v1728_v3 = vpop.permute.xlu1 %428  ;;  %v1730_v57 = vpop.permute.xlu0 %418  ;;  %1237 = vpow2.f32 %v344_v11  ;;  %v371_v18 = vmul.f32 0.6931472, %v1653_v55  ;;  %v96_v42 = vmax.f32 %v1513_v58, 0.0  ;;  %v199_v25 = vmul.f32 0.6931472, %v1676_v36 }
  0x86   :  { %v1220_v56 = vpop.eup %1219  ;;  %2584 = vst [vmem:[#allocation20_spill] sm:$0xff] %v1753_v48  ;;  %1239 = vlog2.f32 %v179_v41  ;;  %v272_v46 = vmax.f32 %v1519_v0, 0.0  ;;  %v375_v52 = vmul.f32 0.6931472, %v1691_v60  ;;  %v95_v7 = vmax.f32 %v1521_v2, 0.0 }
  0x87   :  { %v1757_v62 = vpop.eup %1221  ;;  %1241 = vlog2.f32 %v355_v6  ;;  %v184_v63 = vadd.f32 1.0, %v1220_v56  ;;  %v197_v58 = vmul.f32 0.6931472, %v1694_v1  ;;  %v1793_v56 = vadd.f32 %v193_v29, %v93_v24 }
  0x88   :  { %v1763_v37 = vpop.eup %1223  ;;  %1243 = vlog2.f32 %v182_v5  ;;  %v1785_v5 = vadd.f32 %v195_v20, %v94_v32  ;;  %v1796_v0 = vadd.f32 %v369_v43, %v269_v33  ;;  %v1798_v60 = vadd.f32 %v199_v25, %v96_v42 }
  0x89   :  { %v1740_v54 = vpop.permute.xlu1 %438  ;;  %v1742_v27 = vpop.permute.xlu0 %433  ;;  %1245 = vlog2.f32 %v358_v17  ;;  %v1791_v17 = vadd.f32 %v371_v18, %v270_v47  ;;  %2591 = vst [vmem:[#allocation27_spill] sm:$0xff] %v1793_v56  ;;  %v98_v20 = vmax.f32 %v1538_v26, 0.0  ;;  %v274_v2 = vmax.f32 %v1550_v44, 0.0 }
  0x8a   :  { %v1226_v41 = vpop.eup %1225  ;;  %1247 = vlog2.f32 %v181_v4  ;;  %2589 = vst [vmem:[#allocation25_spill] sm:$0xff] %v1785_v5  ;;  %v271_v4 = vmax.f32 %v1533_v21, 0.0  ;;  %2592 = vst [vmem:[#allocation28_spill] sm:$0xff] %v1796_v0  ;;  %v1806_v47 = vadd.f32 %v375_v52, %v272_v46  ;;  %v373_v18 = vmul.f32 0.6931472, %v1705_v30 }
  0x8b   :  { %v1228_v11 = vpop.eup %1227  ;;  %1249 = vlog2.f32 %v357_v22  ;;  %v360_v61 = vadd.f32 1.0, %v1226_v41  ;;  %2590 = vst [vmem:[#allocation26_spill] sm:$0xff] %v1791_v17  ;;  %2593 = vst [vmem:[#allocation29_spill] sm:$0xff] %v1798_v60  ;;  %v1809_v24 = vadd.f32 %v197_v58, %v95_v7  ;;  %v203_v29 = vmul.f32 0.6931472, %v1719_v13 }
  0x8c   :  { %v1230_v40 = vpop.eup %1229  ;;  %1251 = vlog2.f32 %v184_v63  ;;  %v183_v36 = vadd.f32 1.0, %v1228_v11  ;;  %2594 = vst [vmem:[#allocation30_spill] sm:$0xff] %v1806_v47  ;;  %v97_v26 = vmax.f32 %v1556_v49, 0.0  ;;  %v273_v33 = vmax.f32 %v1558_v51, 0.0 }
  0x8d   :  { %v1765_v14 = vpop.permute.xlu1 %448  ;;  %v1767_v19 = vpop.permute.xlu0 %443  ;;  %v359_v22 = vadd.f32 1.0, %v1230_v40  ;;  %1253 = vlog2.f32 %v360_v61  ;;  %2595 = vst [vmem:[#allocation31_spill] sm:$0xff] %v1809_v24  ;;  %v100_v40 = vmax.f32 %v1570_v8, 0.0  ;;  %v379_v30 = vmul.f32 0.6931472, %v1749_v15 }
  0x8e   :  { %v1232_v6 = vpop.eup %1231  ;;  %1255 = vlog2.f32 %v183_v36  ;;  %v201_v25 = vmul.f32 0.6931472, %v1757_v62  ;;  %v276_v46 = vmax.f32 %v1575_v12, 0.0  ;;  %v99_v52 = vmax.f32 %v1584_v9, 0.0 }
  0x8f   :  { %v1234_v34 = vpop.eup %1233  ;;  %1257 = vlog2.f32 %v359_v22  ;;  %v275_v51 = vmax.f32 %v1593_v38, 0.0  ;;  %v102_v8 = vmax.f32 %v1599_v16, 0.0  ;;  %v1826_v15 = vadd.f32 %v373_v18, %v271_v4  ;;  %v2597_v22 = vld [vmem:[#allocation2_spill] sm:$0xff] }
  0x90   :  { %v1236_v28 = vpop.eup %1235  ;;  %v185_v21 = vadd.f32 1.0, %v1234_v34  ;;  %v278_v34 = vmax.f32 %v1604_v53, 0.0  ;;  %v377_v62 = vmul.f32 0.6931472, %v1763_v37  ;;  %v207_v12 = vmul.f32 0.6931472, %v1232_v6 }
  0x91   :  { %v1781_v55 = vpop.permute.xlu1 %458  ;;  %v1783_v45 = vpop.permute.xlu0 %453  ;;  %2596 = vst [vmem:[#allocation32_spill] sm:$0xff] %v1826_v15  ;;  %v383_v58 = vmul.f32 0.6931472, %v1236_v28  ;;  %v1830_v47 = vadd.f32 %v203_v29, %v98_v20  ;;  %v1836_v4 = vadd.f32 %v379_v30, %v274_v2  ;;  %v1838_v37 = vadd.f32 %v201_v25, %v97_v26  ;;  %v2601_v6 = vld [vmem:[#allocation3_spill] sm:$0xff]  ;;  %v2605_v29 = vld [vmem:[#allocation4_spill] sm:$0xff]  ;;  %v2608_v30 = vld [vmem:[#allocation5_spill] sm:$0xff] }
  0x92   :  { %v1238_v32 = vpop.eup %1237  ;;  %1259 = vlog2.f32 %v185_v21  ;;  %v277_v28 = vmax.f32 %v2601_v6, 0.0  ;;  %v1841_v18 = vadd.f32 %v377_v62, %v273_v33  ;;  %v280_v26 = vmax.f32 %v2608_v30, 0.0  ;;  %v2617_v6 = vld [vmem:[#allocation10_spill] sm:$0xff]  ;;  %v2620_v30 = vld [vmem:[#allocation13_spill] sm:$0xff] }
  0x93   :  { %v1240_v1 = vpop.eup %1239  ;;  %v361_v43 = vadd.f32 1.0, %v1238_v32  ;;  %v101_v32 = vmax.f32 %v2597_v22, 0.0  ;;  %2598 = vst [vmem:[#allocation2_spill] sm:$0xff] %v1830_v47  ;;  %2599 = vst [vmem:[#allocation33_spill] sm:$0xff] %v1836_v4  ;;  %v1845_v20 = vadd.f32 %v383_v58, %v276_v46  ;;  %v2614_v58 = vld [vmem:[#allocation7_spill] sm:$0xff] }
  0x94   :  { %v1242_v11 = vpop.eup %1241  ;;  %v205_v9 = vmul.f32 0.6931472, %v1240_v1  ;;  %2600 = vst [vmem:[#allocation34_spill] sm:$0xff] %v1838_v37  ;;  %2602 = vst [vmem:[#allocation3_spill] sm:$0xff] %v1841_v18 }
  0x95   :  { %v1802_v41 = vpop.permute.xlu1 %468  ;;  %v1804_v63 = vpop.permute.xlu0 %463  ;;  %v381_v36 = vmul.f32 0.6931472, %v1242_v11  ;;  %1261 = vlog2.f32 %v361_v43  ;;  %v1843_v11 = vadd.f32 %v207_v12, %v100_v40  ;;  %2604 = vst [vmem:[#allocation36_spill] sm:$0xff] %v1845_v20  ;;  %v2612_v40 = vld [vmem:[#allocation6_spill] sm:$0xff] }
  0x96   :  { %v1244_v44 = vpop.eup %1243  ;;  %v103_v46 = vmax.f32 %v2612_v40, 0.0  ;;  %v1881_v40 = vmul.f32 %v2617_v6, %v2620_v30  ;;  %v2007_v15 = vmul.f32 %v2617_v6, %v1804_v63 }
  0x97   :  { %v1246_v42 = vpop.eup %1245  ;;  %v211_v38 = vmul.f32 0.6931472, %v1244_v44  ;;  %2603 = vst [vmem:[#allocation35_spill] sm:$0xff] %v1843_v11  ;;  %v104_v44 = vmax.f32 %v2605_v29, 0.0  ;;  %v1867_v29 = vmul.f32 %v2617_v6, %v1707_v31 }
  0x98   :  { %v1248_v13 = vpop.eup %1247  ;;  %v387_v16 = vmul.f32 0.6931472, %v1246_v42  ;;  %v1848_v42 = vadd.f32 %v205_v9, %v99_v52  ;;  %v279_v52 = vmax.f32 %v2614_v58, 0.0  ;;  %v2615_v9 = vld [vmem:[#allocation8_spill] sm:$0xff] }
  0x99   :  { %v1819_v61 = vpop.permute.xlu1 %478  ;;  %v1821_v49 = vpop.permute.xlu0 %473  ;;  %v209_v60 = vmul.f32 0.6931472, %v1248_v13  ;;  %v1850_v13 = vadd.f32 %v381_v36, %v275_v51  ;;  %v1853_v22 = vadd.f32 %v211_v38, %v102_v8  ;;  %v105_v51 = vmax.f32 %v2615_v9, 0.0  ;;  %v2616_v36 = vld [vmem:[#allocation9_spill] sm:$0xff]  ;;  %v2618_v8 = vld [vmem:[#allocation11_spill] sm:$0xff] }
  0x9a   :  { %v1250_v7 = vpop.eup %1249  ;;  %2606 = vst [vmem:[#allocation4_spill] sm:$0xff] %v1848_v42  ;;  %v1885_v58 = vmul.f32 %v2618_v8, %v2620_v30  ;;  %v1935_v11 = vmul.f32 %v2618_v8, %v1742_v27  ;;  %v1961_v4 = vmul.f32 %v2618_v8, %v1767_v19  ;;  %v2019_v56 = vmul.f32 %v2617_v6, %v1819_v61 }
  0x9b   :  { %v1252_v24 = vpop.eup %1251  ;;  %v385_v1 = vmul.f32 0.6931472, %v1250_v7  ;;  %2607 = vst [vmem:[#allocation37_spill] sm:$0xff] %v1850_v13  ;;  %2609 = vst [vmem:[#allocation5_spill] sm:$0xff] %v1853_v22  ;;  %v1855_v7 = vadd.f32 %v387_v16, %v278_v34  ;;  %v1857_v33 = vadd.f32 %v209_v60, %v101_v32  ;;  %v1871_v34 = vmul.f32 %v2618_v8, %v1707_v31  ;;  %v2619_v60 = vld [vmem:[#allocation12_spill] sm:$0xff] }
  0x9c   :  { %v1254_v43 = vpop.eup %1253  ;;  %v215_v2 = vmul.f32 0.6931472, %v1252_v24  ;;  %v281_v24 = vmax.f32 %v2616_v36, 0.0  ;;  %v1875_v32 = vmul.f32 %v2619_v60, %v1707_v31  ;;  %v1889_v9 = vmul.f32 %v2619_v60, %v2620_v30 }
  0x9d   :  { %v1832_v53 = vpop.permute.xlu1 %488  ;;  %v1834_v21 = vpop.permute.xlu0 %483  ;;  %2610 = vst [vmem:[#allocation38_spill] sm:$0xff] %v1855_v7  ;;  %2611 = vst [vmem:[#allocation39_spill] sm:$0xff] %v1857_v33  ;;  %v1860_v12 = vadd.f32 %v385_v1, %v277_v28  ;;  %v391_v28 = vmul.f32 0.6931472, %v1254_v43  ;;  %v1895_v31 = vmul.f32 %v2617_v6, %v1728_v3  ;;  %v1899_v43 = vmul.f32 %v2618_v8, %v1728_v3 }
  0x9e   :  { %v1256_v25 = vpop.eup %1255  ;;  %v1891_v36 = vadd.f32 %v215_v2, %v104_v44  ;;  %v1903_v22 = vmul.f32 %v2619_v60, %v1728_v3  ;;  %v496_v30 = vmul.f32 %v2617_v6, %v1730_v57  ;;  %v717_v44 = vmul.f32 %v2618_v8, %v1730_v57 }
  0x9f   :  { %v1258_v62 = vpop.eup %1257  ;;  %2613 = vst [vmem:[#allocation6_spill] sm:$0xff] %v1860_v12  ;;  %v213_v12 = vmul.f32 0.6931472, %v1256_v25  ;;  %v810_v2 = vmul.f32 %v2619_v60, %v1730_v57  ;;  %v1917_v25 = vmul.f32 %v2618_v8, %v1740_v54  ;;  %v1923_v13 = vadd.f32 %v391_v28, %v280_v26 }
  0xa0   :  { %v1260_v1 = vpop.eup %1259  ;;  %2621 = vst [vmem:[#allocation7_spill] sm:$0xff] %v1891_v36  ;;  %v389_v33 = vmul.f32 0.6931472, %v1258_v62  ;;  %v1913_v36 = vmul.f32 %v2617_v6, %v1740_v54  ;;  %v1927_v20 = vmul.f32 %v2619_v60, %v1740_v54  ;;  %v1931_v57 = vmul.f32 %v2617_v6, %v1742_v27 }
  0xa1   :  { %v1262_v7 = vpop.eup %1261  ;;  %2622 = vst [vmem:[#allocation8_spill] sm:$0xff] %v1923_v13  ;;  %v217_v42 = vmul.f32 0.6931472, %v1260_v1  ;;  %v1939_v18 = vmul.f32 %v2619_v60, %v1742_v27  ;;  %v502_v26 = vmul.f32 %v2617_v6, %v1765_v14  ;;  %v1943_v28 = vadd.f32 %v213_v12, %v103_v46 }
  0xa2   :  { %v517_v38 = vpop.permute.xlu1 %516  ;;  %v1877_v16 = vpop.permute.xlu0 %512  ;;  %v1945_v1 = vadd.f32 %v389_v33, %v279_v52  ;;  %v393_v54 = vmul.f32 0.6931472, %v1262_v7  ;;  %v1949_v13 = vmul.f32 %v2618_v8, %v1765_v14  ;;  %v1953_v37 = vmul.f32 %v2619_v60, %v1765_v14 }
  0xa3   :  { %2623 = vst [vmem:[#allocation9_spill] sm:$0xff] %v1943_v28  ;;  %v1957_v27 = vmul.f32 %v2617_v6, %v1767_v19  ;;  %v1965_v33 = vmul.f32 %v2619_v60, %v1767_v19  ;;  %v504_v7 = vmul.f32 %v2617_v6, %v1781_v55  ;;  %v1971_v46 = vmul.f32 %v2618_v8, %v1781_v55 }
  0xa4   :  { %2624 = vst [vmem:[#allocation10_spill] sm:$0xff] %v1945_v1  ;;  %v1975_v52 = vadd.f32 %v217_v42, %v105_v51  ;;  %v1979_v1 = vmul.f32 %v2619_v60, %v1781_v55  ;;  %v1983_v19 = vmul.f32 %v2617_v6, %v1783_v45  ;;  %v1987_v28 = vmul.f32 %v2618_v8, %v1783_v45 }
  0xa5   :  { %v1991_v47 = vmul.f32 %v2619_v60, %v1783_v45  ;;  %v506_v42 = vmul.f32 %v2617_v6, %v1802_v41  ;;  %v1997_v51 = vmul.f32 %v2618_v8, %v1802_v41  ;;  %v2001_v55 = vmul.f32 %v2619_v60, %v1802_v41 }
  0xa6   :  { %v1919_v62 = vpop.permute.xlu1 %520  ;;  %v1921_v3 = vpop.permute.xlu0 %524  ;;  %2625 = vst [vmem:[#allocation11_spill] sm:$0xff] %v1975_v52  ;;  %v2003_v52 = vadd.f32 %v393_v54, %v281_v24  ;;  %v2011_v45 = vmul.f32 %v2618_v8, %v1804_v63  ;;  %v2015_v0 = vmul.f32 %v2619_v60, %v1804_v63  ;;  %v2023_v41 = vmul.f32 %v2618_v8, %v1819_v61 }
  0xa7   :  { %2626 = vst [vmem:[#allocation12_spill] sm:$0xff] %v1997_v51  ;;  %2627 = vst [vmem:[#allocation13_spill] sm:$0xff] %v2001_v55  ;;  %v2027_v24 = vmul.f32 %v2619_v60, %v1819_v61  ;;  %v2031_v54 = vmul.f32 %v2617_v6, %v1821_v49  ;;  %v2036_v10 = vmul.f32 %v2618_v8, %v1821_v49 }
  0xa8   :  { %2628 = vst [vmem:[#allocation40_spill] sm:$0xff] %v2003_v52  ;;  %2629 = vst [vmem:[#allocation41_spill] sm:$0xff] %v2015_v0  ;;  %v2632_v52 = vld [vmem:[#allocation14_spill] sm:$0xff]  ;;  %v737_v50 = vmul.f32 %v2634_v23, %v517_v38  ;;  %v830_v48 = vmul.f32 %v2635_v39, %v517_v38  ;;  %v2043_v61 = vmul.f32 %v2619_v60, %v1821_v49 }
  0xa9   :  { %2630 = vst [vmem:[#allocation42_spill] sm:$0xff] %v2023_v41  ;;  %2631 = vst [vmem:[#allocation43_spill] sm:$0xff] %v2027_v24  ;;  %v580_v17 = vmul.f32 %v2632_v52, %v517_v38  ;;  %v2047_v24 = vmul.f32 %v2617_v6, %v1832_v53  ;;  %v2051_v41 = vmul.f32 %v2618_v8, %v1832_v53 }
  0xaa   :  { %v529_v14 = vpop.permute.xlu1 %528  ;;  %v1973_v12 = vpop.permute.xlu0 %532  ;;  %2633 = vst [vmem:[#allocation14_spill] sm:$0xff] %v2036_v10  ;;  %2636 = vst [vmem:[#allocation15_spill] sm:$0xff] %v2043_v61  ;;  %v2055_v10 = vmul.f32 %v2619_v60, %v1832_v53  ;;  %v2059_v38 = vmul.f32 %v2617_v6, %v1834_v21  ;;  %v2063_v49 = vmul.f32 %v2618_v8, %v1834_v21 }
  0xab   :  { %2637 = vst [vmem:[#allocation16_spill] sm:$0xff] %v2051_v41  ;;  %v579_v61 = vmul.f32 %v2632_v52, %v1877_v16  ;;  %v2071_v41 = vmul.f32 %v2619_v60, %v1834_v21  ;;  %v2073_v51 = vadd.f32 %v580_v17, %v496_v30  ;;  %v736_v53 = vmul.f32 %v2634_v23, %v1877_v16 }
  0xac   :  { %2638 = vst [vmem:[#allocation44_spill] sm:$0xff] %v2055_v10  ;;  %2639 = vst [vmem:[#allocation45_spill] sm:$0xff] %v2063_v49  ;;  %v829_v6 = vmul.f32 %v2635_v39, %v1877_v16  ;;  %v2079_v49 = vadd.f32 %v737_v50, %v717_v44  ;;  %v2081_v0 = vadd.f32 %v830_v48, %v810_v2 }
  0xad   :  { %2641 = vst [vmem:[#allocation47_spill] sm:$0xff] %v2071_v41  ;;  %2642 = vst [vmem:[#allocation48_spill] sm:$0xff] %v2073_v51  ;;  %v738_v17 = vmul.f32 %v2634_v23, %v1919_v62  ;;  %v831_v60 = vmul.f32 %v2635_v39, %v1919_v62  ;;  %v582_v16 = vmul.f32 %v2632_v52, %v1921_v3 }
  0xae   :  { %v537_v63 = vpop.permute.xlu1 %536  ;;  %v541_v5 = vpop.permute.xlu0 %540  ;;  %v739_v50 = vmul.f32 %v2634_v23, %v1921_v3  ;;  %v2095_v48 = vadd.f32 %v579_v61, %v1881_v40  ;;  %v832_v30 = vmul.f32 %v2635_v39, %v1921_v3  ;;  %v583_v44 = vmul.f32 %v2632_v52, %v529_v14 }
  0xaf   :  { %v586_v35 = vmul.f32 %v2632_v52, %v541_v5  ;;  %v833_v41 = vmul.f32 %v2635_v39, %v529_v14  ;;  %v584_v3 = vmul.f32 %v2632_v52, %v1973_v12 }
  0xb1   :  { %v2067_v55 = vadd.f32 %v586_v35, %v502_v26  ;;  %v581_v35 = vmul.f32 %v2632_v52, %v1919_v62  ;;  %v2103_v26 = vadd.f32 %v736_v53, %v1885_v58  ;;  %v2106_v62 = vadd.f32 %v829_v6, %v1889_v9 }
  0xb2   :  { %v545_v10 = vpop.permute.xlu1 %544  ;;  %v549_v8 = vpop.permute.xlu0 %548  ;;  %v2119_v9 = vadd.f32 %v738_v17, %v1871_v34  ;;  %v2122_v53 = vadd.f32 %v831_v60, %v1875_v32  ;;  %v2131_v6 = vadd.f32 %v832_v30, %v1903_v22  ;;  %v742_v17 = vmul.f32 %v2634_v23, %v537_v63 }
  0xb3   :  { %2640 = vst [vmem:[#allocation46_spill] sm:$0xff] %v2067_v55  ;;  %v588_v21 = vmul.f32 %v2632_v52, %v549_v8  ;;  %v740_v55 = vmul.f32 %v2634_v23, %v529_v14  ;;  %v2111_v61 = vadd.f32 %v581_v35, %v1867_v29  ;;  %v2125_v14 = vadd.f32 %v582_v16, %v1895_v31 }
  0xb4   :  { %v2128_v29 = vadd.f32 %v739_v50, %v1899_v43  ;;  %v2134_v35 = vadd.f32 %v583_v44, %v1931_v57  ;;  %v2144_v31 = vadd.f32 %v833_v41, %v1939_v18  ;;  %v585_v43 = vmul.f32 %v2632_v52, %v537_v63 }
  0xb5   :  { %v2100_v2 = vadd.f32 %v588_v21, %v504_v7  ;;  %v741_v7 = vmul.f32 %v2634_v23, %v1973_v12  ;;  %v834_v21 = vmul.f32 %v2635_v39, %v1973_v12  ;;  %v2141_v32 = vadd.f32 %v740_v55, %v1935_v11 }
  0xb6   :  { %v553_v51 = vpop.permute.xlu1 %552  ;;  %v557_v40 = vpop.permute.xlu0 %556  ;;  %v2149_v57 = vadd.f32 %v584_v3, %v1913_v36  ;;  %v743_v18 = vmul.f32 %v2634_v23, %v541_v5  ;;  %v836_v55 = vmul.f32 %v2635_v39, %v541_v5  ;;  %v587_v41 = vmul.f32 %v2632_v52, %v545_v10 }
  0xb7   :  { %v590_v58 = vmul.f32 %v2632_v52, %v557_v40  ;;  %v2152_v16 = vadd.f32 %v741_v7, %v1917_v25  ;;  %v2161_v50 = vadd.f32 %v834_v21, %v1927_v20  ;;  %v744_v36 = vmul.f32 %v2634_v23, %v545_v10 }
  0xb8   :  { %v2171_v44 = vadd.f32 %v585_v43, %v1957_v27  ;;  %v837_v5 = vmul.f32 %v2635_v39, %v545_v10  ;;  %v745_v3 = vmul.f32 %v2634_v23, %v549_v8  ;;  %v2189_v10 = vadd.f32 %v836_v55, %v1953_v37  ;;  %v2648_v55 = vld [vmem:[#allocation18_spill] sm:$0xff] }
  0xb9   :  { %v2138_v34 = vadd.f32 %v590_v58, %v506_v42  ;;  %v835_v42 = vmul.f32 %v2635_v39, %v537_v63  ;;  %v2174_v63 = vadd.f32 %v742_v17, %v1961_v4  ;;  %v838_v58 = vmul.f32 %v2635_v39, %v549_v8 }
  0xba   :  { %v561_v22 = vpop.permute.xlu1 %560  ;;  %v565_v60 = vpop.permute.xlu0 %564  ;;  %v2186_v4 = vadd.f32 %v743_v18, %v1949_v13  ;;  %v2192_v43 = vadd.f32 %v587_v41, %v1983_v19  ;;  %v2195_v8 = vadd.f32 %v744_v36, %v1987_v28  ;;  %v746_v17 = vmul.f32 %v2634_v23, %v553_v51 }
  0xbb   :  { %2643 = vst [vmem:[#allocation49_spill] sm:$0xff] %v2138_v34  ;;  %v591_v12 = vmul.f32 %v2632_v52, %v561_v22  ;;  %v592_v11 = vmul.f32 %v2632_v52, %v565_v60  ;;  %v2183_v27 = vadd.f32 %v835_v42, %v1965_v33  ;;  %v2205_v13 = vadd.f32 %v837_v5, %v1991_v47  ;;  %v2649_v5 = vld [vmem:[#allocation41_spill] sm:$0xff]  ;;  %v2661_v34 = vld [vmem:[#allocation22_spill] sm:$0xff] }
  0xbc   :  { %v2208_v37 = vadd.f32 %v745_v3, %v1971_v46  ;;  %v747_v19 = vmul.f32 %v2634_v23, %v557_v40  ;;  %v2213_v28 = vadd.f32 %v838_v58, %v1979_v1  ;;  %v841_v18 = vmul.f32 %v2635_v39, %v561_v22  ;;  %v2650_v58 = vld [vmem:[#allocation12_spill] sm:$0xff] }
  0xbd   :  { %v2165_v25 = vadd.f32 %v591_v12, %v2031_v54  ;;  %v2168_v30 = vadd.f32 %v592_v11, %v2019_v56  ;;  %v589_v54 = vmul.f32 %v2632_v52, %v553_v51  ;;  %v749_v46 = vmul.f32 %v2634_v23, %v565_v60 }
  0xbe   :  { %v569_v20 = vpop.permute.xlu1 %568  ;;  %v573_v7 = vpop.permute.xlu0 %572  ;;  %v2225_v1 = vadd.f32 %v746_v17, %v2011_v45  ;;  %v2652_v45 = vld [vmem:[#allocation14_spill] sm:$0xff] }
  0xbf   :  { %2644 = vst [vmem:[#allocation50_spill] sm:$0xff] %v2165_v25  ;;  %2645 = vst [vmem:[#allocation51_spill] sm:$0xff] %v2168_v30  ;;  %v593_v21 = vmul.f32 %v2632_v52, %v569_v20  ;;  %v594_v56 = vmul.f32 %v2632_v52, %v573_v7  ;;  %v839_v52 = vmul.f32 %v2635_v39, %v553_v51 }
  0xc0   :  { %v2216_v11 = vadd.f32 %v589_v54, %v2007_v15  ;;  %v842_v15 = vmul.f32 %v2635_v39, %v565_v60  ;;  %v2270_v25 = vmul.f32 %v2635_v39, %v573_v7 }
  0xc1   :  { %v2199_v12 = vadd.f32 %v593_v21, %v2059_v38  ;;  %v2202_v33 = vadd.f32 %v594_v56, %v2047_v24  ;;  %v840_v38 = vmul.f32 %v2635_v39, %v557_v40  ;;  %v748_v24 = vmul.f32 %v2634_v23, %v561_v22  ;;  %v2651_v56 = vld [vmem:[#allocation13_spill] sm:$0xff] }
  0xc2   :  { %v2231_v3 = vadd.f32 %v839_v52, %v2649_v5  ;;  %v2234_v22 = vadd.f32 %v747_v19, %v2650_v58  ;;  %v2653_v52 = vld [vmem:[#allocation15_spill] sm:$0xff]  ;;  %v2654_v19 = vld [vmem:[#allocation42_spill] sm:$0xff] }
  0xc3   :  { %2646 = vst [vmem:[#allocation52_spill] sm:$0xff] %v2199_v12  ;;  %2647 = vst [vmem:[#allocation53_spill] sm:$0xff] %v2202_v33  ;;  %v613_v42 = vpop.permute.xlu1 %612  ;;  %v617_v47 = vpop.permute.xlu0 %616  ;;  %v2239_v33 = vadd.f32 %v840_v38, %v2651_v56  ;;  %v2242_v17 = vadd.f32 %v748_v24, %v2652_v45  ;;  %v2247_v5 = vadd.f32 %v841_v18, %v2653_v52  ;;  %v2658_v38 = vld [vmem:[#allocation43_spill] sm:$0xff]  ;;  %v2660_v24 = vld [vmem:[#allocation21_spill] sm:$0xff] }
  0xc4   :  { %v772_v51 = vmul.f32 %v2648_v55, %v613_v42  ;;  %v865_v41 = vmul.f32 %v1747_v59, %v613_v42  ;;  %v773_v36 = vmul.f32 %v2648_v55, %v617_v47  ;;  %v866_v40 = vmul.f32 %v1747_v59, %v617_v47 }
  0xc5   :  { %v2250_v58 = vadd.f32 %v749_v46, %v2654_v19  ;;  %v2255_v56 = vadd.f32 %v842_v15, %v2658_v38  ;;  %v750_v18 = vmul.f32 %v2634_v23, %v569_v20  ;;  %v2662_v19 = vld [vmem:[#allocation17_spill] sm:$0xff]  ;;  %v2265_v38 = vmul.f32 %v2634_v23, %v573_v7 }
  0xc6   :  { %v788_v54 = vadd.f32 %v772_v51, %v2103_v26  ;;  %v881_v21 = vadd.f32 %v865_v41, %v2106_v62  ;;  %v789_v60 = vadd.f32 %v773_v36, %v2079_v49  ;;  %v882_v30 = vadd.f32 %v866_v40, %v2081_v0  ;;  %v2656_v26 = vld [vmem:[#allocation19_spill] sm:$0xff]  ;;  %v2657_v62 = vld [vmem:[#allocation20_spill] sm:$0xff] }
  0xc7   :  { %v621_v12 = vpop.permute.xlu1 %620  ;;  %2655 = vst [vmem:[#allocation18_spill] sm:$0xff] %v2250_v58  ;;  %2659 = vst [vmem:[#allocation41_spill] sm:$0xff] %v2255_v56  ;;  %v629_v36 = vpop.permute.xlu0 %628  ;;  %v843_v40 = vmul.f32 %v2635_v39, %v569_v20 }
  0xc8   :  { %v913_v51 = vmul.f32 %v788_v54, %v2656_v26  ;;  %v945_v41 = vmul.f32 %v881_v21, %v2657_v62  ;;  %v914_v45 = vmul.f32 %v789_v60, %v2660_v24  ;;  %v946_v49 = vmul.f32 %v882_v30, %v2661_v34 }
  0xc9   :  { %v774_v0 = vmul.f32 %v2648_v55, %v621_v12  ;;  %v679_v26 = vmul.f32 %v2662_v19, %v613_v42  ;;  %v867_v34 = vmul.f32 %v1747_v59, %v621_v12  ;;  %v776_v56 = vmul.f32 %v2648_v55, %v629_v36 }
  0xca   :  { %v929_v46 = vmul.f32 %v913_v51, %v788_v54  ;;  %v961_v52 = vmul.f32 %v945_v41, %v881_v21  ;;  %v930_v58 = vmul.f32 %v914_v45, %v789_v60  ;;  %v962_v62 = vmul.f32 %v946_v49, %v882_v30  ;;  %v2663_v54 = vld [vmem:[#allocation23_spill] sm:$0xff]  ;;  %v2664_v41 = vld [vmem:[#allocation45_spill] sm:$0xff] }
  0xcb   :  { %v790_v15 = vadd.f32 %v774_v0, %v2119_v9  ;;  %v869_v42 = vmul.f32 %v1747_v59, %v629_v36  ;;  %v680_v30 = vmul.f32 %v2662_v19, %v617_v47  ;;  %v883_v9 = vadd.f32 %v867_v34, %v2122_v53  ;;  %v625_v51 = vpop.permute.xlu1 %624  ;;  %v2667_v34 = vld [vmem:[#allocation26_spill] sm:$0xff] }
  0xcc   :  { %v977_v24 = vadd.f32 %v961_v52, %v929_v46  ;;  %v978_v20 = vadd.f32 %v962_v62, %v930_v58  ;;  %v792_v23 = vadd.f32 %v776_v56, %v2141_v32  ;;  %v2278_v45 = vadd.f32 %v750_v18, %v2664_v41  ;;  %v2665_v46 = vld [vmem:[#allocation24_spill] sm:$0xff]  ;;  %v2666_v62 = vld [vmem:[#allocation25_spill] sm:$0xff]  ;;  %v637_v18 = vpop.permute.xlu0 %636 }
  0xcd   :  { %v915_v21 = vmul.f32 %v790_v15, %v2663_v54  ;;  %v695_v49 = vadd.f32 %v679_v26, %v2095_v48  ;;  %v885_v7 = vadd.f32 %v869_v42, %v2144_v31  ;;  %v947_v52 = vmul.f32 %v883_v9, %v2665_v46  ;;  %v2668_v54 = vld [vmem:[#allocation48_spill] sm:$0xff]  ;;  %v2669_v42 = vld [vmem:[#allocation47_spill] sm:$0xff] }
  0xce   :  { %v993_v60 = vsub.f32 0.0, %v977_v24  ;;  %v994_v39 = vsub.f32 0.0, %v978_v20  ;;  %v917_v24 = vmul.f32 %v792_v23, %v2666_v62  ;;  %v681_v53 = vmul.f32 %v2662_v19, %v621_v12  ;;  %v42_v12 = vld [vmem:[%s2547_s1] sm:$0xff] }
  0xcf   :  { %v931_v0 = vmul.f32 %v915_v21, %v790_v15  ;;  %v949_v32 = vmul.f32 %v885_v7, %v2667_v34  ;;  %v775_v56 = vmul.f32 %v2648_v55, %v625_v51  ;;  %v696_v48 = vadd.f32 %v680_v30, %v2668_v54  ;;  %v633_v62 = vpop.permute.xlu1 %632  ;;  %v2672_v54 = vld [vmem:[#allocation29_spill] sm:$0xff] }
  0xd0   :  { %v1025_v58 = vmul.f32 1.442695, %v993_v60  ;;  %v1027_v47 = vmul.f32 1.442695, %v994_v39  ;;  %v963_v26 = vmul.f32 %v947_v52, %v883_v9  ;;  %v933_v20 = vmul.f32 %v917_v24, %v792_v23 }
  0xd1   :  { %v897_v31 = vmax.f32 %v695_v49, 0.0  ;;  %v965_v15 = vmul.f32 %v949_v32, %v885_v7  ;;  %v791_v21 = vadd.f32 %v775_v56, %v2128_v29  ;;  %v2290_v60 = vadd.f32 %v843_v40, %v2669_v42  ;;  %v2670_v49 = vld [vmem:[#allocation27_spill] sm:$0xff] }
  0xd2   :  { %1263 = vpow2.f32 %v1025_v58  ;;  %v979_v41 = vadd.f32 %v963_v26, %v931_v0  ;;  %v868_v39 = vmul.f32 %v1747_v59, %v625_v51  ;;  %v778_v30 = vmul.f32 %v2648_v55, %v637_v18 }
  0xd3   :  { %1265 = vpow2.f32 %v1027_v47  ;;  %v697_v9 = vadd.f32 %v681_v53, %v2111_v61  ;;  %v981_v23 = vadd.f32 %v965_v15, %v933_v20  ;;  %v916_v7 = vmul.f32 %v791_v21, %v2670_v49  ;;  %v2671_v53 = vld [vmem:[#allocation28_spill] sm:$0xff]  ;;  %v2673_v15 = vld [vmem:[#allocation30_spill] sm:$0xff] }
  0xd4   :  { %v871_v29 = vmul.f32 %v1747_v59, %v637_v18  ;;  %v995_v58 = vsub.f32 0.0, %v979_v41  ;;  %v683_v40 = vmul.f32 %v2662_v19, %v629_v36  ;;  %v884_v46 = vadd.f32 %v868_v39, %v2131_v6  ;;  %v43_v36 = vld [vmem:[%s2547_s1 + $0x8] sm:$0xff] }
  0xd5   :  { %v794_v52 = vadd.f32 %v778_v30, %v2174_v63  ;;  %v1009_v0 = vmul.f32 %v897_v31, %v42_v12  ;;  %v898_v24 = vmax.f32 %v696_v48, 0.0  ;;  %v997_v47 = vsub.f32 0.0, %v981_v23  ;;  %v2311_v48 = vpop.permute.xlu0 %644  ;;  %v44_v23 = vld [vmem:[%s2547_s1 + $0x10] sm:$0xff] }
  0xd6   :  { %v887_v34 = vadd.f32 %v871_v29, %v2183_v27  ;;  %v1029_v32 = vmul.f32 1.442695, %v995_v58  ;;  %v932_v61 = vmul.f32 %v916_v7, %v791_v21  ;;  %v948_v56 = vmul.f32 %v884_v46, %v2671_v53 }
  0xd7   :  { %v919_v26 = vmul.f32 %v794_v52, %v2672_v54  ;;  %v899_v20 = vmax.f32 %v697_v9, 0.0  ;;  %v1033_v6 = vmul.f32 1.442695, %v997_v47  ;;  %v777_v31 = vmul.f32 %v2648_v55, %v633_v62 }
  0xd8   :  { %v951_v63 = vmul.f32 %v887_v34, %v2673_v15  ;;  %1267 = vpow2.f32 %v1029_v32  ;;  %v699_v27 = vadd.f32 %v683_v40, %v2134_v35  ;;  %v964_v21 = vmul.f32 %v948_v56, %v884_v46  ;;  %v2674_v46 = vld [vmem:[#allocation31_spill] sm:$0xff]  ;;  %v2325_v32 = vpop.permute.xlu1 %640 }
  0xd9   :  { %v935_v42 = vmul.f32 %v919_v26, %v794_v52  ;;  %1269 = vpow2.f32 %v1033_v6  ;;  %v682_v12 = vmul.f32 %v2662_v19, %v625_v51  ;;  %v793_v39 = vadd.f32 %v777_v31, %v2152_v16  ;;  %v2675_v26 = vld [vmem:[#allocation32_spill] sm:$0xff] }
  0xda   :  { %v967_v41 = vmul.f32 %v951_v63, %v887_v34  ;;  %v1010_v9 = vmul.f32 %v898_v24, %v43_v36  ;;  %v980_v49 = vadd.f32 %v964_v21, %v932_v61  ;;  %v870_v7 = vmul.f32 %v1747_v59, %v633_v62  ;;  %v2676_v63 = vld [vmem:[#allocation2_spill] sm:$0xff] }
  0xdb   :  { %v780_v35 = vmul.f32 %v2648_v55, %v2311_v48  ;;  %v685_v40 = vmul.f32 %v2662_v19, %v637_v18  ;;  %v918_v52 = vmul.f32 %v793_v39, %v2674_v46  ;;  %v901_v47 = vmax.f32 %v699_v27, 0.0  ;;  %v46_v18 = vld [vmem:[%s2547_s1 + $0x20] sm:$0xff] }
  0xdc   :  { %v1264_v30 = vpop.eup %1263  ;;  %v983_v51 = vadd.f32 %v967_v41, %v935_v42  ;;  %v996_v24 = vsub.f32 0.0, %v980_v49  ;;  %v886_v34 = vadd.f32 %v870_v7, %v2161_v50  ;;  %v1011_v61 = vmul.f32 %v899_v20, %v44_v23  ;;  %v2348_v42 = vpop.permute.xlu0 %652  ;;  %v2677_v23 = vld [vmem:[#allocation33_spill] sm:$0xff] }
  0xdd   :  { %v1266_v29 = vpop.eup %1265  ;;  %v1057_v58 = vmul.f32 %v1264_v30, %v1009_v0  ;;  %v698_v0 = vadd.f32 %v682_v12, %v2125_v14  ;;  %v796_v56 = vadd.f32 %v780_v35, %v2195_v8  ;;  %v934_v54 = vmul.f32 %v918_v52, %v793_v39 }
  0xde   :  { %v1058_v16 = vmul.f32 %v1266_v29, %v1010_v9  ;;  %v999_v53 = vsub.f32 0.0, %v983_v51  ;;  %v1031_v50 = vmul.f32 1.442695, %v996_v24  ;;  %v950_v36 = vmul.f32 %v886_v34, %v2675_v26  ;;  %v2365_v24 = vpop.permute.xlu1 %648 }
  0xdf   :  { %1074 = vst.msk [vmem:[%s2548_s7] sm:$0xff] %vm1073_vm0, %v1057_v58  ;;  %v873_v20 = vmul.f32 %v1747_v59, %v2311_v48  ;;  %v701_v6 = vadd.f32 %v685_v40, %v2171_v44  ;;  %v921_v14 = vmul.f32 %v796_v56, %v2676_v63  ;;  %v779_v8 = vmul.f32 %v2648_v55, %v2325_v32 }
  0xe0   :  { %1075 = vst.msk [vmem:[%s2548_s7 + $0x8] sm:$0xff] %vm1073_vm0, %v1058_v16  ;;  %v1037_v15 = vmul.f32 1.442695, %v999_v53  ;;  %v1013_v31 = vmul.f32 %v901_v47, %v46_v18  ;;  %1271 = vpow2.f32 %v1031_v50  ;;  %v966_v27 = vmul.f32 %v950_v36, %v886_v34  ;;  %v2680_v36 = vld [vmem:[#allocation35_spill] sm:$0xff] }
  0xe1   :  { %v889_v21 = vadd.f32 %v873_v20, %v2205_v13  ;;  %v900_v12 = vmax.f32 %v698_v0, 0.0  ;;  %v684_v41 = vmul.f32 %v2662_v19, %v633_v62  ;;  %v795_v39 = vadd.f32 %v779_v8, %v2186_v4  ;;  %v2678_v13 = vld [vmem:[#allocation34_spill] sm:$0xff]  ;;  %v45_v4 = vld [vmem:[%s2547_s1 + $0x18] sm:$0xff]  ;;  %v48_v62 = vld [vmem:[%s2547_s1 + $0x30] sm:$0xff] }
  0xe2   :  { %1273 = vpow2.f32 %v1037_v15  ;;  %v1268_v44 = vpop.eup %1267  ;;  %v982_v30 = vadd.f32 %v966_v27, %v934_v54  ;;  %v937_v9 = vmul.f32 %v921_v14, %v796_v56  ;;  %v872_v7 = vmul.f32 %v1747_v59, %v2325_v32  ;;  %v2679_v56 = vld [vmem:[#allocation3_spill] sm:$0xff] }
  0xe3   :  { %v953_v49 = vmul.f32 %v889_v21, %v2677_v23  ;;  %v1270_v35 = vpop.eup %1269  ;;  %v1059_v29 = vmul.f32 %v1268_v44, %v1011_v61  ;;  %v903_v58 = vmax.f32 %v701_v6, 0.0  ;;  %v920_v40 = vmul.f32 %v795_v39, %v2678_v13 }
  0xe4   :  { %v782_v51 = vmul.f32 %v2648_v55, %v2348_v42  ;;  %v1061_v46 = vmul.f32 %v1270_v35, %v1013_v31  ;;  %v998_v52 = vsub.f32 0.0, %v982_v30  ;;  %v888_v47 = vadd.f32 %v872_v7, %v2189_v10  ;;  %v661_v35 = vpop.permute.xlu0 %660 }
  0xe5   :  { %v969_v16 = vmul.f32 %v953_v49, %v889_v21  ;;  %1076 = vst.msk [vmem:[%s2548_s7 + $0x10] sm:$0xff] %vm1073_vm0, %v1059_v29  ;;  %v700_v34 = vadd.f32 %v684_v41, %v2149_v57  ;;  %v687_v61 = vmul.f32 %v2662_v19, %v2311_v48  ;;  %v936_v18 = vmul.f32 %v920_v40, %v795_v39  ;;  %v47_v21 = vld [vmem:[%s2547_s1 + $0x28] sm:$0xff]  ;;  %v2681_v39 = vld [vmem:[#allocation36_spill] sm:$0xff]  ;;  %v2401_v40 = vpop.permute.xlu1 %656 }
  0xe6   :  { %v798_v0 = vadd.f32 %v782_v51, %v2225_v1  ;;  %1078 = vst.msk [vmem:[%s2548_s7 + $0x20] sm:$0xff] %vm1073_vm0, %v1061_v46  ;;  %v1035_v10 = vmul.f32 1.442695, %v998_v52  ;;  %v952_v50 = vmul.f32 %v888_v47, %v2679_v56  ;;  %v875_v54 = vmul.f32 %v1747_v59, %v2348_v42  ;;  %v2683_v49 = vld [vmem:[#allocation4_spill] sm:$0xff] }
  0xe7   :  { %v985_v53 = vadd.f32 %v969_v16, %v937_v9  ;;  %v1012_v26 = vmul.f32 %v900_v12, %v45_v4  ;;  %v1015_v57 = vmul.f32 %v903_v58, %v48_v62  ;;  %v781_v48 = vmul.f32 %v2648_v55, %v2365_v24  ;;  %v50_v4 = vld [vmem:[%s2547_s1 + $0x40] sm:$0xff] }
  0xe8   :  { %v923_v20 = vmul.f32 %v798_v0, %v2680_v36  ;;  %1275 = vpow2.f32 %v1035_v10  ;;  %v968_v6 = vmul.f32 %v952_v50, %v888_v47  ;;  %v891_v15 = vadd.f32 %v875_v54, %v2231_v3  ;;  %v2682_v3 = vld [vmem:[#allocation16_spill] sm:$0xff] }
  0xe9   :  { %v1001_v1 = vsub.f32 0.0, %v985_v53  ;;  %v902_v63 = vmax.f32 %v700_v34, 0.0  ;;  %v703_v14 = vadd.f32 %v687_v61, %v2192_v43  ;;  %v797_v31 = vadd.f32 %v781_v48, %v2208_v37  ;;  %v2684_v34 = vld [vmem:[#allocation46_spill] sm:$0xff]  ;;  %v2686_v48 = vld [vmem:[#allocation5_spill] sm:$0xff] }
  0xea   :  { %v939_v8 = vmul.f32 %v923_v20, %v798_v0  ;;  %v1272_v27 = vpop.eup %1271  ;;  %v984_v41 = vadd.f32 %v968_v6, %v936_v18  ;;  %v955_v44 = vmul.f32 %v891_v15, %v2681_v39  ;;  %v874_v30 = vmul.f32 %v1747_v59, %v2365_v24  ;;  %v2685_v18 = vld [vmem:[#allocation37_spill] sm:$0xff]  ;;  %v2687_v6 = vld [vmem:[#allocation38_spill] sm:$0xff] }
  0xeb   :  { %v1041_v12 = vmul.f32 1.442695, %v1001_v1  ;;  %v2396_v23 = vadd.f32 %v2265_v38, %v2682_v3  ;;  %v1060_v43 = vmul.f32 %v1272_v27, %v1012_v26  ;;  %v686_v37 = vmul.f32 %v2662_v19, %v2325_v32  ;;  %v2432_v27 = vpop.permute.xlu0 %668 }
  0xec   :  { %v1274_v9 = vpop.eup %1273  ;;  %v922_v7 = vmul.f32 %v797_v31, %v2683_v49  ;;  %v1000_v58 = vsub.f32 0.0, %v984_v41  ;;  %v971_v13 = vmul.f32 %v955_v44, %v891_v15  ;;  %v1014_v38 = vmul.f32 %v902_v63, %v47_v21 }
  0xed   :  { %v1063_v29 = vmul.f32 %v1274_v9, %v1015_v57  ;;  %1277 = vpow2.f32 %v1041_v12  ;;  %1077 = vst.msk [vmem:[%s2548_s7 + $0x18] sm:$0xff] %vm1073_vm0, %v1060_v43  ;;  %v905_v51 = vmax.f32 %v703_v14, 0.0  ;;  %v689_v46 = vmul.f32 %v2662_v19, %v2348_v42  ;;  %v2444_v9 = vpop.permute.xlu1 %664  ;;  %v52_v43 = vld [vmem:[%s2547_s1 + $0x50] sm:$0xff] }
  0xee   :  { %v890_v32 = vadd.f32 %v874_v30, %v2213_v28  ;;  %v1039_v62 = vmul.f32 1.442695, %v1000_v58  ;;  %v987_v52 = vadd.f32 %v971_v13, %v939_v8  ;;  %v784_v16 = vmul.f32 %v2648_v55, %v661_v35 }
  0xef   :  { %1080 = vst.msk [vmem:[%s2548_s7 + $0x30] sm:$0xff] %vm1073_vm0, %v1063_v29  ;;  %v877_v47 = vmul.f32 %v1747_v59, %v661_v35  ;;  %v702_v61 = vadd.f32 %v686_v37, %v2684_v34  ;;  %v938_v42 = vmul.f32 %v922_v7, %v797_v31  ;;  %v783_v0 = vmul.f32 %v2648_v55, %v2401_v40  ;;  %v2688_v31 = vld [vmem:[#allocation39_spill] sm:$0xff] }
  0xf0   :  { %v954_v28 = vmul.f32 %v890_v32, %v2685_v18  ;;  %1279 = vpow2.f32 %v1039_v62  ;;  %v1003_v10 = vsub.f32 0.0, %v987_v52  ;;  %v800_v53 = vadd.f32 %v784_v16, %v2242_v17 }
  0xf1   :  { %v893_v56 = vadd.f32 %v877_v47, %v2247_v5  ;;  %v1017_v50 = vmul.f32 %v905_v51, %v50_v4  ;;  %v705_v54 = vadd.f32 %v689_v46, %v2216_v11  ;;  %v799_v57 = vadd.f32 %v783_v0, %v2234_v22  ;;  %v49_v11 = vld [vmem:[%s2547_s1 + $0x38] sm:$0xff] }
  0xf2   :  { %v970_v26 = vmul.f32 %v954_v28, %v890_v32  ;;  %v1276_v36 = vpop.eup %1275  ;;  %v1045_v20 = vmul.f32 1.442695, %v1003_v10  ;;  %v925_v1 = vmul.f32 %v800_v53, %v2686_v48  ;;  %v876_v63 = vmul.f32 %v1747_v59, %v2401_v40  ;;  %v2692_v28 = vld [vmem:[#allocation50_spill] sm:$0xff] }
  0xf3   :  { %v957_v15 = vmul.f32 %v893_v56, %v2687_v6  ;;  %v1062_v14 = vmul.f32 %v1276_v36, %v1014_v38  ;;  %v904_v8 = vmax.f32 %v702_v61, 0.0  ;;  %v924_v5 = vmul.f32 %v799_v57, %v2688_v31  ;;  %v2690_v61 = vld [vmem:[#allocation7_spill] sm:$0xff]  ;;  %v2693_v10 = vld [vmem:[#allocation18_spill] sm:$0xff]  ;;  %v2696_v31 = vld [vmem:[#allocation44_spill] sm:$0xff] }
  0xf4   :  { %v986_v17 = vadd.f32 %v970_v26, %v938_v42  ;;  %1281 = vpow2.f32 %v1045_v20  ;;  %v941_v22 = vmul.f32 %v925_v1, %v800_v53  ;;  %v892_v12 = vadd.f32 %v876_v63, %v2239_v33  ;;  %v2689_v33 = vld [vmem:[#allocation6_spill] sm:$0xff]  ;;  %v2694_v20 = vld [vmem:[#allocation41_spill] sm:$0xff] }
  0xf5   :  { %v973_v21 = vmul.f32 %v957_v15, %v893_v56  ;;  %1079 = vst.msk [vmem:[%s2548_s7 + $0x28] sm:$0xff] %vm1073_vm0, %v1062_v14  ;;  %v907_v41 = vmax.f32 %v705_v54, 0.0  ;;  %v688_v39 = vmul.f32 %v2662_v19, %v2365_v24  ;;  %v940_v30 = vmul.f32 %v924_v5, %v799_v57  ;;  %v2695_v1 = vld [vmem:[#allocation9_spill] sm:$0xff] }
  0xf6   :  { %v1002_v44 = vsub.f32 0.0, %v986_v17  ;;  %v956_v49 = vmul.f32 %v892_v12, %v2689_v33  ;;  %v786_v7 = vmul.f32 %v2648_v55, %v2432_v27  ;;  %v879_v29 = vmul.f32 %v1747_v59, %v2432_v27 }
  0xf7   :  { %v1278_v3 = vpop.eup %1277  ;;  %v989_v37 = vadd.f32 %v973_v21, %v941_v22  ;;  %v1016_v24 = vmul.f32 %v904_v8, %v49_v11  ;;  %v691_v38 = vmul.f32 %v2662_v19, %v661_v35  ;;  %v1019_v62 = vmul.f32 %v907_v41, %v52_v43  ;;  %v51_v22 = vld [vmem:[%s2547_s1 + $0x48] sm:$0xff]  ;;  %v2697_v21 = vld [vmem:[#allocation10_spill] sm:$0xff] }
  0xf8   :  { %v1065_v58 = vmul.f32 %v1278_v3, %v1017_v50  ;;  %v1043_v13 = vmul.f32 1.442695, %v1002_v44  ;;  %v972_v46 = vmul.f32 %v956_v49, %v892_v12  ;;  %v802_v32 = vadd.f32 %v786_v7, %v2278_v45  ;;  %v2691_v45 = vld [vmem:[#allocation8_spill] sm:$0xff]  ;;  %v2699_v49 = vld [vmem:[#allocation11_spill] sm:$0xff] }
  0xf9   :  { %v1005_v51 = vsub.f32 0.0, %v989_v37  ;;  %v895_v4 = vadd.f32 %v879_v29, %v2290_v60  ;;  %v704_v52 = vadd.f32 %v688_v39, %v2100_v2  ;;  %v785_v16 = vmul.f32 %v2648_v55, %v2444_v9  ;;  %v673_v2 = vpop.permute.xlu1 %672 }
  0xfa   :  { %1082 = vst.msk [vmem:[%s2548_s7 + $0x40] sm:$0xff] %vm1073_vm0, %v1065_v58  ;;  %1283 = vpow2.f32 %v1043_v13  ;;  %v1280_v47 = vpop.eup %1279  ;;  %v988_v34 = vadd.f32 %v972_v46, %v940_v30  ;;  %v927_v42 = vmul.f32 %v802_v32, %v2690_v61  ;;  %v707_v0 = vadd.f32 %v691_v38, %v2692_v28  ;;  %v2700_v58 = vld [vmem:[#allocation40_spill] sm:$0xff] }
  0xfb   :  { %v1049_v35 = vmul.f32 1.442695, %v1005_v51  ;;  %v959_v18 = vmul.f32 %v895_v4, %v2691_v45  ;;  %v1064_v60 = vmul.f32 %v1280_v47, %v1016_v24  ;;  %v801_v53 = vadd.f32 %v785_v16, %v2693_v10  ;;  %v53_v16 = vld [vmem:[%s2547_s1 + $0x58] sm:$0xff]  ;;  %v56_v28 = vld [vmem:[%s2547_s1 + $0x70] sm:$0xff] }
  0xfc   :  { %v878_v56 = vmul.f32 %v1747_v59, %v2444_v9  ;;  %v1004_v50 = vsub.f32 0.0, %v988_v34  ;;  %v943_v54 = vmul.f32 %v927_v42, %v802_v32  ;;  %v906_v57 = vmax.f32 %v704_v52, 0.0  ;;  %v2701_v32 = vld [vmem:[#allocation52_spill] sm:$0xff] }
  0xfd   :  { %1285 = vpow2.f32 %v1049_v35  ;;  %v975_v26 = vmul.f32 %v959_v18, %v895_v4  ;;  %1081 = vst.msk [vmem:[%s2548_s7 + $0x38] sm:$0xff] %vm1073_vm0, %v1064_v60  ;;  %v690_v36 = vmul.f32 %v2662_v19, %v2401_v40  ;;  %v926_v6 = vmul.f32 %v801_v53, %v2695_v1 }
  0xfe   :  { %v894_v48 = vadd.f32 %v878_v56, %v2694_v20  ;;  %v1282_v15 = vpop.eup %1281  ;;  %v1047_v63 = vmul.f32 1.442695, %v1004_v50  ;;  %v787_v8 = vmul.f32 %v2648_v55, %v673_v2  ;;  %v880_v17 = vmul.f32 %v1747_v59, %v673_v2  ;;  %v54_v59 = vld [vmem:[%s2547_s1 + $0x60] sm:$0xff] }
  0xff   :  { %v991_v14 = vadd.f32 %v975_v26, %v943_v54  ;;  %v860_v5 = vadd.f32 %v2270_v25, %v2696_v31  ;;  %v1067_v11 = vmul.f32 %v1282_v15, %v1019_v62  ;;  %v942_v40 = vmul.f32 %v926_v6, %v801_v53  ;;  %v2698_v25 = vld [vmem:[#allocation49_spill] sm:$0xff] }
 0x100   :  { %v958_v12 = vmul.f32 %v894_v48, %v2697_v21  ;;  %v909_v41 = vmax.f32 %v707_v0, 0.0  ;;  %1287 = vpow2.f32 %v1047_v63  ;;  %v803_v44 = vadd.f32 %v787_v8, %v2396_v23  ;;  %v2702_v0 = vld [vmem:[#allocation51_spill] sm:$0xff]  ;;  %v57_v6 = vld [vmem:[%s2547_s1 + $0x78] sm:$0xff] }
 0x101   :  { %v1007_v39 = vsub.f32 0.0, %v991_v14  ;;  %1084 = vst.msk [vmem:[%s2548_s7 + $0x50] sm:$0xff] %vm1073_vm0, %v1067_v11  ;;  %v706_v55 = vadd.f32 %v690_v36, %v2698_v25  ;;  %v693_v30 = vmul.f32 %v2662_v19, %v2432_v27  ;;  %v896_v43 = vadd.f32 %v880_v17, %v860_v5 }
 0x102   :  { %v974_v3 = vmul.f32 %v958_v12, %v894_v48  ;;  %v1018_v37 = vmul.f32 %v906_v57, %v51_v22  ;;  %v928_v23 = vmul.f32 %v803_v44, %v2699_v49  ;;  %v1021_v38 = vmul.f32 %v909_v41, %v54_v59  ;;  %v2703_v57 = vld [vmem:[#allocation53_spill] sm:$0xff]  ;;  %v55_v48 = vld [vmem:[%s2547_s1 + $0x68] sm:$0xff] }
 0x103   :  { %v1053_v33 = vmul.f32 1.442695, %v1007_v39  ;;  %v960_v24 = vmul.f32 %v896_v43, %v2700_v58  ;;  %v908_v46 = vmax.f32 %v706_v55, 0.0  ;;  %v709_v4 = vadd.f32 %v693_v30, %v2701_v32 }
 0x104   :  { %v1284_v7 = vpop.eup %1283  ;;  %v990_v29 = vadd.f32 %v974_v3, %v942_v40  ;;  %v944_v51 = vmul.f32 %v928_v23, %v803_v44  ;;  %v692_v47 = vmul.f32 %v2662_v19, %v2444_v9  ;;  %v694_v9 = vmul.f32 %v2662_v19, %v673_v2 }
 0x105   :  { %v1066_v13 = vmul.f32 %v1284_v7, %v1018_v37  ;;  %1289 = vpow2.f32 %v1053_v33  ;;  %v976_v52 = vmul.f32 %v960_v24, %v896_v43  ;;  %v1020_v42 = vmul.f32 %v908_v46, %v53_v16 }
 0x106   :  { %v1006_v62 = vsub.f32 0.0, %v990_v29  ;;  %v911_v45 = vmax.f32 %v709_v4, 0.0  ;;  %v708_v10 = vadd.f32 %v692_v47, %v2702_v0  ;;  %v710_v36 = vadd.f32 %v694_v9, %v2703_v57 }
 0x107   :  { %v1286_v27 = vpop.eup %1285  ;;  %1083 = vst.msk [vmem:[%s2548_s7 + $0x48] sm:$0xff] %vm1073_vm0, %v1066_v13  ;;  %v992_v61 = vadd.f32 %v976_v52, %v944_v51 }
 0x108   :  { %v1069_v35 = vmul.f32 %v1286_v27, %v1021_v38  ;;  %v1051_v34 = vmul.f32 1.442695, %v1006_v62  ;;  %v1023_v50 = vmul.f32 %v911_v45, %v56_v28  ;;  %v910_v26 = vmax.f32 %v708_v10, 0.0 }
 0x109   :  { %v1008_v18 = vsub.f32 0.0, %v992_v61  ;;  %v912_v2 = vmax.f32 %v710_v36, 0.0 }
 0x10a   :  { %1086 = vst.msk [vmem:[%s2548_s7 + $0x60] sm:$0xff] %vm1073_vm0, %v1069_v35  ;;  %1291 = vpow2.f32 %v1051_v34  ;;  %v1288_v60 = vpop.eup %1287  ;;  %v1022_v19 = vmul.f32 %v910_v26, %v55_v48 }
 0x10b   :  { %v1068_v53 = vmul.f32 %v1288_v60, %v1020_v42  ;;  %v1055_v56 = vmul.f32 1.442695, %v1008_v18  ;;  %v1024_v63 = vmul.f32 %v912_v2, %v57_v6 }
 0x10d   :  { %1085 = vst.msk [vmem:[%s2548_s7 + $0x58] sm:$0xff] %vm1073_vm0, %v1068_v53  ;;  %1293 = vpow2.f32 %v1055_v56 }
 0x10f   :  { %v1290_v54 = vpop.eup %1289 }
 0x110   :  { %v1071_v20 = vmul.f32 %v1290_v54, %v1023_v50 }
 0x112   :  { %1088 = vst.msk [vmem:[%s2548_s7 + $0x70] sm:$0xff] %vm1073_vm0, %v1071_v20 }
 0x114   :  { %v1292_v1 = vpop.eup %1291 }
 0x115   :  { %v1070_v15 = vmul.f32 %v1292_v1, %v1022_v19 }
 0x117   :  { %1087 = vst.msk [vmem:[%s2548_s7 + $0x68] sm:$0xff] %vm1073_vm0, %v1070_v15  ;;  %v1294_v14 = vpop.eup %1293 }
 0x118   :  { %v1072_v8 = vmul.f32 %v1294_v14, %v1024_v63 }
 0x11a   :  { %1089 = vst.msk [vmem:[%s2548_s7 + $0x78] sm:$0xff] %vm1073_vm0, %v1072_v8 }

</bundles_post_ra>
